<compile_context>
chip_gen: v7x
topology: tpu7x:2x2x1
jax: 0.10.0
libtpu: 0.0.40
codegen_flags: <defaults>
</compile_context>

<pallas_src>
import functools

import jax
import jax.numpy as jnp
from jax import lax
from jax.experimental import pallas as pl
from jax.experimental.pallas import tpu as pltpu


def _round_up(x, m):
    return ((x + m - 1) // m) * m


def _cdiv(a, b):
    return (a + b - 1) // b


def _pad_gate_rows(w, h, hp):
    """(3H, ...) -> (3Hp, ...): zero-pad each gate block (r, z, n) separately."""
    pad = [(0, hp - h)] + [(0, 0)] * (w.ndim - 1)
    return jnp.concatenate(
        [jnp.pad(w[g * h:(g + 1) * h], pad) for g in range(3)], axis=0)


def _vmem_capacity_bytes():
    try:
        return int(pltpu.get_tpu_info().vmem_capacity_bytes)
    except Exception:
        return 64 * 1024 * 1024   # conservative fallback: v7x per-core VMEM


def _pick_batch_tiling(B):
    if B < 16:
        b_tile = _round_up(max(B, 1), 8)
        n_b = 1
    elif B <= 256:
        # >=2 batch tiles so the leading "parallel" grid axis can shard across
        # both v7x TensorCores (each tile keeps >=8 real rows).
        b_tile = _round_up(_cdiv(B, 2), 8)
        n_b = 2
    else:
        b_tile = 128
        n_b = _cdiv(B, 128)
    return b_tile, n_b


def _pick_time_chunk(T, b_tile, hp, ip, wbytes, vmem_budget, cap=None):
    """Largest time chunk whose VMEM footprint fits the per-generation budget."""
    resident = (ip * 3 * hp * wbytes                   # w_ih^T   (single buffer)
                + 8 * 3 * hp * 4                       # gi bias
                + hp * 3 * hp * wbytes                 # w_hh^T   (single buffer)
                + 8 * hp * 4                           # b_hn
                + 2 * b_tile * hp * 4)                 # h output block (double buffer)
    per_step = (2 * b_tile * ip * 4                    # x chunk (double-buffered input)
                + b_tile * 3 * hp * 4)                 # gi scratch (single buffer)
    t_max = max(1, (vmem_budget - resident) // per_step)
    t_chunk = int(min(t_max, T, 256))
    if cap is not None:
        t_chunk = min(t_chunk, int(cap))
    return max(1, t_chunk)


def _make_gru_kernel(t_chunk, b_tile, hp, seq_len, needs_mask, unroll):
    def kernel(x_ref, w_ih_t_ref, gi_bias_ref, w_hh_t_ref, b_hn_ref,
               h_ref, gi_ref):
        """One (batch-tile, time-chunk) grid step.

        x_ref      : (t_chunk*b_tile, Ip)  contiguous, time-major-within-chunk
        w_ih_t_ref : (Ip, 3Hp)   resident, single-buffered
        gi_bias_ref: (1, 3Hp)    b_ih + (b_hr|b_hz) folded
        w_hh_t_ref : (Hp, 3Hp)   resident, single-buffered
        b_hn_ref   : (1, Hp)     must stay inside r*(W_hn h + b_hn)
        h_ref      : (b_tile, Hp) OUTPUT block, doubles as the hidden-state
                     carry across time chunks (constant out index over t).
        gi_ref     : (t_chunk*b_tile, 3Hp) f32 VMEM scratch.
        """
        t = pl.program_id(1)

        @pl.when(t == 0)
        def _():
            h_ref[...] = jnp.zeros_like(h_ref)

        w_ih_t = w_ih_t_ref[...]
        w_hh_t = w_hh_t_ref[...]

        # Whole-chunk input projection: ONE big MXU matmul, off the serial
        # per-timestep critical path; lands in a single-buffered scratch.
        gi_ref[...] = (jnp.dot(x_ref[...].astype(w_ih_t.dtype), w_ih_t,
                               preferred_element_type=jnp.float32)
                       + gi_bias_ref[...])

        # Hoisted broadcast (JAX does not CSE broadcast_in_dim inside the loop).
        b_hn = jnp.broadcast_to(b_hn_ref[...], (b_tile, hp))

        def sigm(v):
            # sigmoid(v) == 0.5*tanh(0.5*v)+0.5 : one native EUP tanh instead
            # of exp + reciprocal.
            return 0.5 * jnp.tanh(0.5 * v) + 0.5

        def step(i, h):
            row = pl.multiple_of(i * b_tile, b_tile)
            gi = gi_ref[pl.ds(row, b_tile), :]                    # (b_tile, 3Hp)
            gh = jnp.dot(h.astype(w_hh_t.dtype), w_hh_t,
                         preferred_element_type=jnp.float32)      # (b_tile, 3Hp)
            # Gate slices sit on 128-lane boundaries (Hp multiple of 128).
            r = sigm(gi[:, 0:hp] + gh[:, 0:hp])
            z = sigm(gi[:, hp:2 * hp] + gh[:, hp:2 * hp])
            n = jnp.tanh(gi[:, 2 * hp:3 * hp] + r * (gh[:, 2 * hp:3 * hp] + b_hn))
            h_new = (1.0 - z) * n + z * h
            if needs_mask:
                h_new = jnp.where(t * t_chunk + i < seq_len, h_new, h)
            return h_new

        h_ref[...] = lax.fori_loop(0, t_chunk, step, h_ref[...], unroll=unroll)

    return kernel


def gru_model_forward(x, params, *, weight_dtype=jnp.bfloat16,
                      max_time_chunk=None):
    """GRUModel forward. x: (B, T, I) float32. Returns (B, O) float32."""
    w_ih, w_hh, b_ih, b_hh = (params["w_ih"], params["w_hh"],
                              params["b_ih"], params["b_hh"])
    w_fc, b_fc = params["w_fc"], params["b_fc"]
    B, T, I = x.shape
    H = w_hh.shape[1]
    f32 = jnp.float32
    wbytes = jnp.dtype(weight_dtype).itemsize

    # Lane-align gate/hidden and input dims.
    Hp = _round_up(H, 128)
    Ip = _round_up(I, 128)

    # Batch tiling (sublane-aligned; >=2 tiles when possible for v7x megacore).
    b_tile, n_b = _pick_batch_tiling(B)
    B_pad = n_b * b_tile

    # Per-generation VMEM budget / limit (v5e/v6e ~128 MiB, v7x ~64 MiB).
    vmem_cap = _vmem_capacity_bytes()
    vmem_budget = int(vmem_cap * 0.70)
    vmem_limit = int(vmem_cap * 0.85)

    t_chunk = _pick_time_chunk(T, b_tile, Hp, Ip, wbytes, vmem_budget,
                               cap=max_time_chunk)
    n_t = _cdiv(T, t_chunk)
    Tp = n_t * t_chunk
    needs_mask = (Tp != T)

    # Bounded partial unroll: keep LLO scheduling visibility without spilling
    # the ~(b_tile x 3Hp) live gi/gh temporaries out of the 64-vreg file.
    step_vregs = (b_tile * 3 * Hp * 4) // 4096
    if step_vregs <= 12:
        unroll = 8
    elif step_vregs <= 24:
        unroll = 4
    else:
        unroll = 2
    unroll = max(1, min(unroll, t_chunk))

    # --- weights / biases: gate-padded, transposed, cast to weight_dtype -----
    w_ih_pad = jnp.pad(_pad_gate_rows(w_ih.astype(f32), H, Hp),
                       ((0, 0), (0, Ip - I)))                      # (3Hp, Ip)
    w_ih_t = jnp.transpose(w_ih_pad)                               # (Ip, 3Hp)
    w_hh_p = _pad_gate_rows(w_hh.astype(f32), H, Hp)               # (3Hp, H)
    w_hh_t = jnp.transpose(jnp.pad(w_hh_p, ((0, 0), (0, Hp - H)))) # (Hp, 3Hp)

    b_ih_p = _pad_gate_rows(b_ih.astype(f32), H, Hp)               # (3Hp,)
    b_hh_p = _pad_gate_rows(b_hh.astype(f32), H, Hp)               # (3Hp,)
    b_hn = b_hh_p[2 * Hp:].reshape(1, Hp)
    # Fold b_ih (all gates) and b_hr, b_hz into the input-projection bias;
    # only b_hn must remain inside r * (W_hn h + b_hn).
    gi_bias = (b_ih_p + jnp.concatenate(
        [b_hh_p[:2 * Hp], jnp.zeros((Hp,), f32)])).reshape(1, 3 * Hp)

    w_ih_t = w_ih_t.astype(weight_dtype)
    w_hh_t = w_hh_t.astype(weight_dtype)

    # --- x relayout: fully contiguous (t_chunk*b_tile, Ip) chunks in HBM,
    #     time-major within each chunk -------------------------------------
    x_p = jnp.pad(x.astype(f32),
                  ((0, B_pad - B), (0, Tp - T), (0, Ip - I)))
    x_tiled = (x_p.reshape(n_b, b_tile, n_t, t_chunk, Ip)
               .transpose(0, 2, 3, 1, 4)
               .reshape(n_b * n_t * t_chunk * b_tile, Ip))

    M = t_chunk * b_tile
    kernel = _make_gru_kernel(t_chunk, b_tile, Hp, T, needs_mask, unroll)

    grid_spec = pltpu.PrefetchScalarGridSpec(
        num_scalar_prefetch=0,
        grid=(n_b, n_t),
        in_specs=[
            # Streamed input chunk (double-buffered); each block is one
            # contiguous HBM slab thanks to the wrapper-side relayout.
            pl.BlockSpec((M, Ip), lambda b, t: (b * n_t + t, 0)),
            # Resident weights / biases: constant index map + single buffer.
            pl.BlockSpec((Ip, 3 * Hp), lambda b, t: (0, 0),
                         pipeline_mode=pl.Buffered(1)),
            pl.BlockSpec((1, 3 * Hp), lambda b, t: (0, 0),
                         pipeline_mode=pl.Buffered(1)),
            pl.BlockSpec((Hp, 3 * Hp), lambda b, t: (0, 0),
                         pipeline_mode=pl.Buffered(1)),
            pl.BlockSpec((1, Hp), lambda b, t: (0, 0),
                         pipeline_mode=pl.Buffered(1)),
        ],
        # Output block doubles as the hidden-state carry across time chunks
        # (same block index for every t -> resident accumulator); lane-dense.
        out_specs=pl.BlockSpec((b_tile, Hp), lambda b, t: (b, 0)),
        scratch_shapes=[pltpu.VMEM((M, 3 * Hp), jnp.float32)],
    )

    h_last = pl.pallas_call(
        kernel,
        out_shape=jax.ShapeDtypeStruct((B_pad, Hp), jnp.float32),
        grid_spec=grid_spec,
        compiler_params=pltpu.CompilerParams(
            # Batch tiles are independent; time must stay sequential (h carry).
            dimension_semantics=("parallel", "arbitrary"),
            vmem_limit_bytes=vmem_limit,
        ),
    )(x_tiled, w_ih_t, gi_bias, w_hh_t, b_hn)

    # Final Linear on the last hidden state: tiny, runs in plain XLA so the fc
    # weight does not occupy VMEM for the whole recurrence.
    h_last = h_last[:B, :H]
    return h_last @ jnp.transpose(w_fc.astype(f32)) + b_fc.astype(f32)


def init_params(key, input_size, hidden_size, output_size):
    """Deterministic synthetic params, PyTorch-shaped (gate order r,z,n)."""
    ks = jax.random.split(key, 6)
    k = 1.0 / jnp.sqrt(hidden_size)
    u = lambda kk, shape: jax.random.uniform(kk, shape, jnp.float32, -k, k)
    return {
        "w_ih": u(ks[0], (3 * hidden_size, input_size)),
        "w_hh": u(ks[1], (3 * hidden_size, hidden_size)),
        "b_ih": u(ks[2], (3 * hidden_size,)),
        "b_hh": u(ks[3], (3 * hidden_size,)),
        "w_fc": u(ks[4], (output_size, hidden_size)),
        "b_fc": u(ks[5], (output_size,)),
    }


def gru_model_ref(x, params):
    """Pure-JAX reference mirroring torch.nn.GRU + Linear semantics."""
    w_ih, w_hh, b_ih, b_hh = (params["w_ih"], params["w_hh"],
                              params["b_ih"], params["b_hh"])
    w_fc, b_fc = params["w_fc"], params["b_fc"]
    B, T, _ = x.shape
    H = w_hh.shape[1]
    h = jnp.zeros((B, H), jnp.float32)
    for t in range(T):
        gi = x[:, t, :] @ w_ih.T + b_ih
        gh = h @ w_hh.T + b_hh
        r = jax.nn.sigmoid(gi[:, :H] + gh[:, :H])
        z = jax.nn.sigmoid(gi[:, H:2 * H] + gh[:, H:2 * H])
        n = jnp.tanh(gi[:, 2 * H:] + r * gh[:, 2 * H:])
        h = (1.0 - z) * n + z * h
    return h @ w_fc.T + b_fc


if __name__ == "__main__":
    B, T, I, H, O = 2, 8, 4, 32, 8

    key = jax.random.PRNGKey(0)
    k_x, k_p = jax.random.split(key)
    x = jax.random.normal(k_x, (B, T, I), jnp.float32)
    params = init_params(k_p, I, H, O)
    ref = gru_model_ref(x, params)

    # Exact-parity path: f32 weights, tight tolerance.
    fwd_f32 = jax.jit(functools.partial(gru_model_forward,
                                        weight_dtype=jnp.float32))
    out_f32 = jax.block_until_ready(fwd_f32(x, params))
    assert out_f32.shape == (B, O)
    err = float(jnp.max(jnp.abs(out_f32 - ref)))
    assert err < 1e-4, f"f32 path mismatch: max err {err}"

    # Default fast path: bf16 weights on the critical-path matmuls.
    fwd = jax.jit(gru_model_forward)
    out = jax.block_until_ready(fwd(x, params))
    assert out.shape == (B, O)
    err_bf16 = float(jnp.max(jnp.abs(out - ref)))
    assert err_bf16 < 1e-1, f"bf16 path mismatch: max err {err_bf16}"

    # Multi-chunk / multi-batch-tile / masked-tail path (exercises the h carry
    # across time chunks and the T % t_chunk != 0 masking).
    B2, T2 = 20, 13
    x2 = jax.random.normal(jax.random.PRNGKey(1), (B2, T2, I), jnp.float32)
    fwd_chunked = jax.jit(functools.partial(gru_model_forward,
                                            weight_dtype=jnp.float32,
                                            max_time_chunk=5))
    out2 = jax.block_until_ready(fwd_chunked(x2, params))
    ref2 = gru_model_ref(x2, params)
    err2 = float(jnp.max(jnp.abs(out2 - ref2)))
    assert err2 < 1e-4, f"chunked path mismatch: max err {err2}"

    print("KERNEL_OK")
</pallas_src>

<mosaic_0001>
module attributes {stable_mosaic.version = 11 : i64} {
  func.func @kernel(%arg0: i32, %arg1: i32, %arg2: memref<64x128xf32, #tpu.memory_space<vmem>>, %arg3: memref<128x384xf32, #tpu.memory_space<vmem>>, %arg4: memref<1x384xf32, #tpu.memory_space<vmem>>, %arg5: memref<128x384xf32, #tpu.memory_space<vmem>>, %arg6: memref<1x128xf32, #tpu.memory_space<vmem>>, %arg7: memref<8x128xf32, #tpu.memory_space<vmem>>, %arg8: memref<64x384xf32, #tpu.memory_space<vmem>>) attributes {dimension_semantics = [#tpu.dimension_semantics<parallel>, #tpu.dimension_semantics<arbitrary>], iteration_bounds = array<i64: 1, 1>, scalar_prefetch = 0 : i64, scratch_operands = 1 : i64, tpu.core_type = #tpu.core_type<tc>, window_params = [{transform_indices = @transform_0, window_bounds = array<i64: 64, 128>}, {pipeline_mode = #tpu.pipeline_mode<synchronous>, transform_indices = @transform_1, window_bounds = array<i64: 128, 384>}, {pipeline_mode = #tpu.pipeline_mode<synchronous>, transform_indices = @transform_2, window_bounds = array<i64: 1, 384>}, {pipeline_mode = #tpu.pipeline_mode<synchronous>, transform_indices = @transform_3, window_bounds = array<i64: 128, 384>}, {pipeline_mode = #tpu.pipeline_mode<synchronous>, transform_indices = @transform_4, window_bounds = array<i64: 1, 128>}, {transform_indices = @transform_5, window_bounds = array<i64: 8, 128>}]} {
    %c0_i32 = arith.constant 0 : i32
    %0 = arith.cmpi eq, %arg1, %c0_i32 : i32
    %1 = arith.extui %0 : i1 to i32
    %c0_i32_0 = arith.constant 0 : i32
    %2 = arith.cmpi ne, %1, %c0_i32_0 : i32
    scf.if %2 {
      %cst_97 = arith.constant 0.000000e+00 : f32
      %304 = vector.broadcast %cst_97 : f32 to vector<8x128xf32>
      %c0_98 = arith.constant 0 : index
      %c0_99 = arith.constant 0 : index
      %305 = vector.load %arg7[%c0_98, %c0_99] : memref<8x128xf32, #tpu.memory_space<vmem>>, vector<8x128xf32>
      tpu.vector_store %arg7[%c0_98, %c0_99], %304 {strides = array<i32>} : memref<8x128xf32, #tpu.memory_space<vmem>>, vector<8x128xf32>,
    } else {
    }
    %c0 = arith.constant 0 : index
    %c0_1 = arith.constant 0 : index
    %3 = vector.load %arg3[%c0, %c0_1] : memref<128x384xf32, #tpu.memory_space<vmem>>, vector<128x384xf32>
    %c0_2 = arith.constant 0 : index
    %c0_3 = arith.constant 0 : index
    %4 = vector.load %arg5[%c0_2, %c0_3] : memref<128x384xf32, #tpu.memory_space<vmem>>, vector<128x384xf32>
    %c0_4 = arith.constant 0 : index
    %c0_5 = arith.constant 0 : index
    %5 = vector.load %arg2[%c0_4, %c0_5] : memref<64x128xf32, #tpu.memory_space<vmem>>, vector<64x128xf32>
    %cst = arith.constant dense<0.000000e+00> : vector<64x384xf32>
    %6 = tpu.matmul %5, %3, %cst {dimension_numbers = #tpu.dot_dimension_numbers<[1], [0], [0], [1], [0, 0, 1, 1], [], []>} : vector<64x128xf32>, vector<128x384xf32>, vector<64x384xf32> -> vector<64x384xf32>
    %c0_6 = arith.constant 0 : index
    %c0_7 = arith.constant 0 : index
    %7 = vector.load %arg4[%c0_6, %c0_7] : memref<1x384xf32, #tpu.memory_space<vmem>>, vector<1x384xf32>
    %8 = vector.broadcast %7 : vector<1x384xf32> to vector<64x384xf32>
    %9 = arith.addf %6, %8 : vector<64x384xf32>
    %c0_8 = arith.constant 0 : index
    %c0_9 = arith.constant 0 : index
    %10 = vector.load %arg8[%c0_8, %c0_9] : memref<64x384xf32, #tpu.memory_space<vmem>>, vector<64x384xf32>
    tpu.vector_store %arg8[%c0_8, %c0_9], %9 {strides = array<i32>} : memref<64x384xf32, #tpu.memory_space<vmem>>, vector<64x384xf32>,
    %c0_10 = arith.constant 0 : index
    %c0_11 = arith.constant 0 : index
    %11 = vector.load %arg6[%c0_10, %c0_11] : memref<1x128xf32, #tpu.memory_space<vmem>>, vector<1x128xf32>
    %12 = vector.shape_cast %11 : vector<1x128xf32> to vector<1x128xf32>
    %13 = vector.broadcast %12 : vector<1x128xf32> to vector<8x128xf32>
    %c0_12 = arith.constant 0 : index
    %c0_13 = arith.constant 0 : index
    %14 = vector.load %arg7[%c0_12, %c0_13] : memref<8x128xf32, #tpu.memory_space<vmem>>, vector<8x128xf32>
    %c0_i32_14 = arith.constant 0 : i32
    %c8_i32 = arith.constant 8 : i32
    %15 = arith.muli %c0_i32_14, %c8_i32 : i32
    %16 = tpu.assume_multiple %15, 8 : i32
    %17 = arith.index_cast %16 : i32 to index
    %c0_15 = arith.constant 0 : index
    %18 = vector.load %arg8[%17, %c0_15] : memref<64x384xf32, #tpu.memory_space<vmem>>, vector<8x384xf32>
    %cst_16 = arith.constant dense<0.000000e+00> : vector<8x384xf32>
    %19 = tpu.matmul %14, %4, %cst_16 {dimension_numbers = #tpu.dot_dimension_numbers<[1], [0], [0], [1], [0, 0, 1, 1], [], []>} : vector<8x128xf32>, vector<128x384xf32>, vector<8x384xf32> -> vector<8x384xf32>
    %20 = vector.extract_strided_slice %18 {offsets = [0, 0], sizes = [8, 128], strides = [1, 1]} : vector<8x384xf32> to vector<8x128xf32>
    %21 = vector.extract_strided_slice %19 {offsets = [0, 0], sizes = [8, 128], strides = [1, 1]} : vector<8x384xf32> to vector<8x128xf32>
    %22 = arith.addf %20, %21 : vector<8x128xf32>
    %cst_17 = arith.constant 5.000000e-01 : f32
    %23 = vector.broadcast %cst_17 : f32 to vector<8x128xf32>
    %24 = arith.mulf %23, %22 : vector<8x128xf32>
    %25 = math.tanh %24 : vector<8x128xf32>
    %cst_18 = arith.constant 5.000000e-01 : f32
    %26 = vector.broadcast %cst_18 : f32 to vector<8x128xf32>
    %27 = arith.mulf %26, %25 : vector<8x128xf32>
    %cst_19 = arith.constant 5.000000e-01 : f32
    %28 = vector.broadcast %cst_19 : f32 to vector<8x128xf32>
    %29 = arith.addf %27, %28 : vector<8x128xf32>
    %30 = vector.extract_strided_slice %18 {offsets = [0, 128], sizes = [8, 128], strides = [1, 1]} : vector<8x384xf32> to vector<8x128xf32>
    %31 = vector.extract_strided_slice %19 {offsets = [0, 128], sizes = [8, 128], strides = [1, 1]} : vector<8x384xf32> to vector<8x128xf32>
    %32 = arith.addf %30, %31 : vector<8x128xf32>
    %cst_20 = arith.constant 5.000000e-01 : f32
    %33 = vector.broadcast %cst_20 : f32 to vector<8x128xf32>
    %34 = arith.mulf %33, %32 : vector<8x128xf32>
    %35 = math.tanh %34 : vector<8x128xf32>
    %cst_21 = arith.constant 5.000000e-01 : f32
    %36 = vector.broadcast %cst_21 : f32 to vector<8x128xf32>
    %37 = arith.mulf %36, %35 : vector<8x128xf32>
    %cst_22 = arith.constant 5.000000e-01 : f32
    %38 = vector.broadcast %cst_22 : f32 to vector<8x128xf32>
    %39 = arith.addf %37, %38 : vector<8x128xf32>
    %40 = vector.extract_strided_slice %18 {offsets = [0, 256], sizes = [8, 128], strides = [1, 1]} : vector<8x384xf32> to vector<8x128xf32>
    %41 = vector.extract_strided_slice %19 {offsets = [0, 256], sizes = [8, 128], strides = [1, 1]} : vector<8x384xf32> to vector<8x128xf32>
    %42 = arith.addf %41, %13 : vector<8x128xf32>
    %43 = arith.mulf %29, %42 : vector<8x128xf32>
    %44 = arith.addf %40, %43 : vector<8x128xf32>
    %45 = math.tanh %44 : vector<8x128xf32>
    %cst_23 = arith.constant 1.000000e+00 : f32
    %46 = vector.broadcast %cst_23 : f32 to vector<8x128xf32>
    %47 = arith.subf %46, %39 : vector<8x128xf32>
    %48 = arith.mulf %47, %45 : vector<8x128xf32>
    %49 = arith.mulf %39, %14 : vector<8x128xf32>
    %50 = arith.addf %48, %49 : vector<8x128xf32>
    %c1_i32 = arith.constant 1 : i32
    %c8_i32_24 = arith.constant 8 : i32
    %51 = arith.muli %c1_i32, %c8_i32_24 : i32
    %52 = tpu.assume_multiple %51, 8 : i32
    %53 = arith.index_cast %52 : i32 to index
    %c0_25 = arith.constant 0 : index
    %54 = vector.load %arg8[%53, %c0_25] : memref<64x384xf32, #tpu.memory_space<vmem>>, vector<8x384xf32>
    %cst_26 = arith.constant dense<0.000000e+00> : vector<8x384xf32>
    %55 = tpu.matmul %50, %4, %cst_26 {dimension_numbers = #tpu.dot_dimension_numbers<[1], [0], [0], [1], [0, 0, 1, 1], [], []>} : vector<8x128xf32>, vector<128x384xf32>, vector<8x384xf32> -> vector<8x384xf32>
    %56 = vector.extract_strided_slice %54 {offsets = [0, 0], sizes = [8, 128], strides = [1, 1]} : vector<8x384xf32> to vector<8x128xf32>
    %57 = vector.extract_strided_slice %55 {offsets = [0, 0], sizes = [8, 128], strides = [1, 1]} : vector<8x384xf32> to vector<8x128xf32>
    %58 = arith.addf %56, %57 : vector<8x128xf32>
    %cst_27 = arith.constant 5.000000e-01 : f32
    %59 = vector.broadcast %cst_27 : f32 to vector<8x128xf32>
    %60 = arith.mulf %59, %58 : vector<8x128xf32>
    %61 = math.tanh %60 : vector<8x128xf32>
    %cst_28 = arith.constant 5.000000e-01 : f32
    %62 = vector.broadcast %cst_28 : f32 to vector<8x128xf32>
    %63 = arith.mulf %62, %61 : vector<8x128xf32>
    %cst_29 = arith.constant 5.000000e-01 : f32
    %64 = vector.broadcast %cst_29 : f32 to vector<8x128xf32>
    %65 = arith.addf %63, %64 : vector<8x128xf32>
    %66 = vector.extract_strided_slice %54 {offsets = [0, 128], sizes = [8, 128], strides = [1, 1]} : vector<8x384xf32> to vector<8x128xf32>
    %67 = vector.extract_strided_slice %55 {offsets = [0, 128], sizes = [8, 128], strides = [1, 1]} : vector<8x384xf32> to vector<8x128xf32>
    %68 = arith.addf %66, %67 : vector<8x128xf32>
    %cst_30 = arith.constant 5.000000e-01 : f32
    %69 = vector.broadcast %cst_30 : f32 to vector<8x128xf32>
    %70 = arith.mulf %69, %68 : vector<8x128xf32>
    %71 = math.tanh %70 : vector<8x128xf32>
    %cst_31 = arith.constant 5.000000e-01 : f32
    %72 = vector.broadcast %cst_31 : f32 to vector<8x128xf32>
    %73 = arith.mulf %72, %71 : vector<8x128xf32>
    %cst_32 = arith.constant 5.000000e-01 : f32
    %74 = vector.broadcast %cst_32 : f32 to vector<8x128xf32>
    %75 = arith.addf %73, %74 : vector<8x128xf32>
    %76 = vector.extract_strided_slice %54 {offsets = [0, 256], sizes = [8, 128], strides = [1, 1]} : vector<8x384xf32> to vector<8x128xf32>
    %77 = vector.extract_strided_slice %55 {offsets = [0, 256], sizes = [8, 128], strides = [1, 1]} : vector<8x384xf32> to vector<8x128xf32>
    %78 = arith.addf %77, %13 : vector<8x128xf32>
    %79 = arith.mulf %65, %78 : vector<8x128xf32>
    %80 = arith.addf %76, %79 : vector<8x128xf32>
    %81 = math.tanh %80 : vector<8x128xf32>
    %cst_33 = arith.constant 1.000000e+00 : f32
    %82 = vector.broadcast %cst_33 : f32 to vector<8x128xf32>
    %83 = arith.subf %82, %75 : vector<8x128xf32>
    %84 = arith.mulf %83, %81 : vector<8x128xf32>
    %85 = arith.mulf %75, %50 : vector<8x128xf32>
    %86 = arith.addf %84, %85 : vector<8x128xf32>
    %c2_i32 = arith.constant 2 : i32
    %c8_i32_34 = arith.constant 8 : i32
    %87 = arith.muli %c2_i32, %c8_i32_34 : i32
    %88 = tpu.assume_multiple %87, 8 : i32
    %89 = arith.index_cast %88 : i32 to index
    %c0_35 = arith.constant 0 : index
    %90 = vector.load %arg8[%89, %c0_35] : memref<64x384xf32, #tpu.memory_space<vmem>>, vector<8x384xf32>
    %cst_36 = arith.constant dense<0.000000e+00> : vector<8x384xf32>
    %91 = tpu.matmul %86, %4, %cst_36 {dimension_numbers = #tpu.dot_dimension_numbers<[1], [0], [0], [1], [0, 0, 1, 1], [], []>} : vector<8x128xf32>, vector<128x384xf32>, vector<8x384xf32> -> vector<8x384xf32>
    %92 = vector.extract_strided_slice %90 {offsets = [0, 0], sizes = [8, 128], strides = [1, 1]} : vector<8x384xf32> to vector<8x128xf32>
    %93 = vector.extract_strided_slice %91 {offsets = [0, 0], sizes = [8, 128], strides = [1, 1]} : vector<8x384xf32> to vector<8x128xf32>
    %94 = arith.addf %92, %93 : vector<8x128xf32>
    %cst_37 = arith.constant 5.000000e-01 : f32
    %95 = vector.broadcast %cst_37 : f32 to vector<8x128xf32>
    %96 = arith.mulf %95, %94 : vector<8x128xf32>
    %97 = math.tanh %96 : vector<8x128xf32>
    %cst_38 = arith.constant 5.000000e-01 : f32
    %98 = vector.broadcast %cst_38 : f32 to vector<8x128xf32>
    %99 = arith.mulf %98, %97 : vector<8x128xf32>
    %cst_39 = arith.constant 5.000000e-01 : f32
    %100 = vector.broadcast %cst_39 : f32 to vector<8x128xf32>
    %101 = arith.addf %99, %100 : vector<8x128xf32>
    %102 = vector.extract_strided_slice %90 {offsets = [0, 128], sizes = [8, 128], strides = [1, 1]} : vector<8x384xf32> to vector<8x128xf32>
    %103 = vector.extract_strided_slice %91 {offsets = [0, 128], sizes = [8, 128], strides = [1, 1]} : vector<8x384xf32> to vector<8x128xf32>
    %104 = arith.addf %102, %103 : vector<8x128xf32>
    %cst_40 = arith.constant 5.000000e-01 : f32
    %105 = vector.broadcast %cst_40 : f32 to vector<8x128xf32>
    %106 = arith.mulf %105, %104 : vector<8x128xf32>
    %107 = math.tanh %106 : vector<8x128xf32>
    %cst_41 = arith.constant 5.000000e-01 : f32
    %108 = vector.broadcast %cst_41 : f32 to vector<8x128xf32>
    %109 = arith.mulf %108, %107 : vector<8x128xf32>
    %cst_42 = arith.constant 5.000000e-01 : f32
    %110 = vector.broadcast %cst_42 : f32 to vector<8x128xf32>
    %111 = arith.addf %109, %110 : vector<8x128xf32>
    %112 = vector.extract_strided_slice %90 {offsets = [0, 256], sizes = [8, 128], strides = [1, 1]} : vector<8x384xf32> to vector<8x128xf32>
    %113 = vector.extract_strided_slice %91 {offsets = [0, 256], sizes = [8, 128], strides = [1, 1]} : vector<8x384xf32> to vector<8x128xf32>
    %114 = arith.addf %113, %13 : vector<8x128xf32>
    %115 = arith.mulf %101, %114 : vector<8x128xf32>
    %116 = arith.addf %112, %115 : vector<8x128xf32>
    %117 = math.tanh %116 : vector<8x128xf32>
    %cst_43 = arith.constant 1.000000e+00 : f32
    %118 = vector.broadcast %cst_43 : f32 to vector<8x128xf32>
    %119 = arith.subf %118, %111 : vector<8x128xf32>
    %120 = arith.mulf %119, %117 : vector<8x128xf32>
    %121 = arith.mulf %111, %86 : vector<8x128xf32>
    %122 = arith.addf %120, %121 : vector<8x128xf32>
    %c3_i32 = arith.constant 3 : i32
    %c8_i32_44 = arith.constant 8 : i32
    %123 = arith.muli %c3_i32, %c8_i32_44 : i32
    %124 = tpu.assume_multiple %123, 8 : i32
    %125 = arith.index_cast %124 : i32 to index
    %c0_45 = arith.constant 0 : index
    %126 = vector.load %arg8[%125, %c0_45] : memref<64x384xf32, #tpu.memory_space<vmem>>, vector<8x384xf32>
    %cst_46 = arith.constant dense<0.000000e+00> : vector<8x384xf32>
    %127 = tpu.matmul %122, %4, %cst_46 {dimension_numbers = #tpu.dot_dimension_numbers<[1], [0], [0], [1], [0, 0, 1, 1], [], []>} : vector<8x128xf32>, vector<128x384xf32>, vector<8x384xf32> -> vector<8x384xf32>
    %128 = vector.extract_strided_slice %126 {offsets = [0, 0], sizes = [8, 128], strides = [1, 1]} : vector<8x384xf32> to vector<8x128xf32>
    %129 = vector.extract_strided_slice %127 {offsets = [0, 0], sizes = [8, 128], strides = [1, 1]} : vector<8x384xf32> to vector<8x128xf32>
    %130 = arith.addf %128, %129 : vector<8x128xf32>
    %cst_47 = arith.constant 5.000000e-01 : f32
    %131 = vector.broadcast %cst_47 : f32 to vector<8x128xf32>
    %132 = arith.mulf %131, %130 : vector<8x128xf32>
    %133 = math.tanh %132 : vector<8x128xf32>
    %cst_48 = arith.constant 5.000000e-01 : f32
    %134 = vector.broadcast %cst_48 : f32 to vector<8x128xf32>
    %135 = arith.mulf %134, %133 : vector<8x128xf32>
    %cst_49 = arith.constant 5.000000e-01 : f32
    %136 = vector.broadcast %cst_49 : f32 to vector<8x128xf32>
    %137 = arith.addf %135, %136 : vector<8x128xf32>
    %138 = vector.extract_strided_slice %126 {offsets = [0, 128], sizes = [8, 128], strides = [1, 1]} : vector<8x384xf32> to vector<8x128xf32>
    %139 = vector.extract_strided_slice %127 {offsets = [0, 128], sizes = [8, 128], strides = [1, 1]} : vector<8x384xf32> to vector<8x128xf32>
    %140 = arith.addf %138, %139 : vector<8x128xf32>
    %cst_50 = arith.constant 5.000000e-01 : f32
    %141 = vector.broadcast %cst_50 : f32 to vector<8x128xf32>
    %142 = arith.mulf %141, %140 : vector<8x128xf32>
    %143 = math.tanh %142 : vector<8x128xf32>
    %cst_51 = arith.constant 5.000000e-01 : f32
    %144 = vector.broadcast %cst_51 : f32 to vector<8x128xf32>
    %145 = arith.mulf %144, %143 : vector<8x128xf32>
    %cst_52 = arith.constant 5.000000e-01 : f32
    %146 = vector.broadcast %cst_52 : f32 to vector<8x128xf32>
    %147 = arith.addf %145, %146 : vector<8x128xf32>
    %148 = vector.extract_strided_slice %126 {offsets = [0, 256], sizes = [8, 128], strides = [1, 1]} : vector<8x384xf32> to vector<8x128xf32>
    %149 = vector.extract_strided_slice %127 {offsets = [0, 256], sizes = [8, 128], strides = [1, 1]} : vector<8x384xf32> to vector<8x128xf32>
    %150 = arith.addf %149, %13 : vector<8x128xf32>
    %151 = arith.mulf %137, %150 : vector<8x128xf32>
    %152 = arith.addf %148, %151 : vector<8x128xf32>
    %153 = math.tanh %152 : vector<8x128xf32>
    %cst_53 = arith.constant 1.000000e+00 : f32
    %154 = vector.broadcast %cst_53 : f32 to vector<8x128xf32>
    %155 = arith.subf %154, %147 : vector<8x128xf32>
    %156 = arith.mulf %155, %153 : vector<8x128xf32>
    %157 = arith.mulf %147, %122 : vector<8x128xf32>
    %158 = arith.addf %156, %157 : vector<8x128xf32>
    %c4_i32 = arith.constant 4 : i32
    %c8_i32_54 = arith.constant 8 : i32
    %159 = arith.muli %c4_i32, %c8_i32_54 : i32
    %160 = tpu.assume_multiple %159, 8 : i32
    %161 = arith.index_cast %160 : i32 to index
    %c0_55 = arith.constant 0 : index
    %162 = vector.load %arg8[%161, %c0_55] : memref<64x384xf32, #tpu.memory_space<vmem>>, vector<8x384xf32>
    %cst_56 = arith.constant dense<0.000000e+00> : vector<8x384xf32>
    %163 = tpu.matmul %158, %4, %cst_56 {dimension_numbers = #tpu.dot_dimension_numbers<[1], [0], [0], [1], [0, 0, 1, 1], [], []>} : vector<8x128xf32>, vector<128x384xf32>, vector<8x384xf32> -> vector<8x384xf32>
    %164 = vector.extract_strided_slice %162 {offsets = [0, 0], sizes = [8, 128], strides = [1, 1]} : vector<8x384xf32> to vector<8x128xf32>
    %165 = vector.extract_strided_slice %163 {offsets = [0, 0], sizes = [8, 128], strides = [1, 1]} : vector<8x384xf32> to vector<8x128xf32>
    %166 = arith.addf %164, %165 : vector<8x128xf32>
    %cst_57 = arith.constant 5.000000e-01 : f32
    %167 = vector.broadcast %cst_57 : f32 to vector<8x128xf32>
    %168 = arith.mulf %167, %166 : vector<8x128xf32>
    %169 = math.tanh %168 : vector<8x128xf32>
    %cst_58 = arith.constant 5.000000e-01 : f32
    %170 = vector.broadcast %cst_58 : f32 to vector<8x128xf32>
    %171 = arith.mulf %170, %169 : vector<8x128xf32>
    %cst_59 = arith.constant 5.000000e-01 : f32
    %172 = vector.broadcast %cst_59 : f32 to vector<8x128xf32>
    %173 = arith.addf %171, %172 : vector<8x128xf32>
    %174 = vector.extract_strided_slice %162 {offsets = [0, 128], sizes = [8, 128], strides = [1, 1]} : vector<8x384xf32> to vector<8x128xf32>
    %175 = vector.extract_strided_slice %163 {offsets = [0, 128], sizes = [8, 128], strides = [1, 1]} : vector<8x384xf32> to vector<8x128xf32>
    %176 = arith.addf %174, %175 : vector<8x128xf32>
    %cst_60 = arith.constant 5.000000e-01 : f32
    %177 = vector.broadcast %cst_60 : f32 to vector<8x128xf32>
    %178 = arith.mulf %177, %176 : vector<8x128xf32>
    %179 = math.tanh %178 : vector<8x128xf32>
    %cst_61 = arith.constant 5.000000e-01 : f32
    %180 = vector.broadcast %cst_61 : f32 to vector<8x128xf32>
    %181 = arith.mulf %180, %179 : vector<8x128xf32>
    %cst_62 = arith.constant 5.000000e-01 : f32
    %182 = vector.broadcast %cst_62 : f32 to vector<8x128xf32>
    %183 = arith.addf %181, %182 : vector<8x128xf32>
    %184 = vector.extract_strided_slice %162 {offsets = [0, 256], sizes = [8, 128], strides = [1, 1]} : vector<8x384xf32> to vector<8x128xf32>
    %185 = vector.extract_strided_slice %163 {offsets = [0, 256], sizes = [8, 128], strides = [1, 1]} : vector<8x384xf32> to vector<8x128xf32>
    %186 = arith.addf %185, %13 : vector<8x128xf32>
    %187 = arith.mulf %173, %186 : vector<8x128xf32>
    %188 = arith.addf %184, %187 : vector<8x128xf32>
    %189 = math.tanh %188 : vector<8x128xf32>
    %cst_63 = arith.constant 1.000000e+00 : f32
    %190 = vector.broadcast %cst_63 : f32 to vector<8x128xf32>
    %191 = arith.subf %190, %183 : vector<8x128xf32>
    %192 = arith.mulf %191, %189 : vector<8x128xf32>
    %193 = arith.mulf %183, %158 : vector<8x128xf32>
    %194 = arith.addf %192, %193 : vector<8x128xf32>
    %c5_i32 = arith.constant 5 : i32
    %c8_i32_64 = arith.constant 8 : i32
    %195 = arith.muli %c5_i32, %c8_i32_64 : i32
    %196 = tpu.assume_multiple %195, 8 : i32
    %197 = arith.index_cast %196 : i32 to index
    %c0_65 = arith.constant 0 : index
    %198 = vector.load %arg8[%197, %c0_65] : memref<64x384xf32, #tpu.memory_space<vmem>>, vector<8x384xf32>
    %cst_66 = arith.constant dense<0.000000e+00> : vector<8x384xf32>
    %199 = tpu.matmul %194, %4, %cst_66 {dimension_numbers = #tpu.dot_dimension_numbers<[1], [0], [0], [1], [0, 0, 1, 1], [], []>} : vector<8x128xf32>, vector<128x384xf32>, vector<8x384xf32> -> vector<8x384xf32>
    %200 = vector.extract_strided_slice %198 {offsets = [0, 0], sizes = [8, 128], strides = [1, 1]} : vector<8x384xf32> to vector<8x128xf32>
    %201 = vector.extract_strided_slice %199 {offsets = [0, 0], sizes = [8, 128], strides = [1, 1]} : vector<8x384xf32> to vector<8x128xf32>
    %202 = arith.addf %200, %201 : vector<8x128xf32>
    %cst_67 = arith.constant 5.000000e-01 : f32
    %203 = vector.broadcast %cst_67 : f32 to vector<8x128xf32>
    %204 = arith.mulf %203, %202 : vector<8x128xf32>
    %205 = math.tanh %204 : vector<8x128xf32>
    %cst_68 = arith.constant 5.000000e-01 : f32
    %206 = vector.broadcast %cst_68 : f32 to vector<8x128xf32>
    %207 = arith.mulf %206, %205 : vector<8x128xf32>
    %cst_69 = arith.constant 5.000000e-01 : f32
    %208 = vector.broadcast %cst_69 : f32 to vector<8x128xf32>
    %209 = arith.addf %207, %208 : vector<8x128xf32>
    %210 = vector.extract_strided_slice %198 {offsets = [0, 128], sizes = [8, 128], strides = [1, 1]} : vector<8x384xf32> to vector<8x128xf32>
    %211 = vector.extract_strided_slice %199 {offsets = [0, 128], sizes = [8, 128], strides = [1, 1]} : vector<8x384xf32> to vector<8x128xf32>
    %212 = arith.addf %210, %211 : vector<8x128xf32>
    %cst_70 = arith.constant 5.000000e-01 : f32
    %213 = vector.broadcast %cst_70 : f32 to vector<8x128xf32>
    %214 = arith.mulf %213, %212 : vector<8x128xf32>
    %215 = math.tanh %214 : vector<8x128xf32>
    %cst_71 = arith.constant 5.000000e-01 : f32
    %216 = vector.broadcast %cst_71 : f32 to vector<8x128xf32>
    %217 = arith.mulf %216, %215 : vector<8x128xf32>
    %cst_72 = arith.constant 5.000000e-01 : f32
    %218 = vector.broadcast %cst_72 : f32 to vector<8x128xf32>
    %219 = arith.addf %217, %218 : vector<8x128xf32>
    %220 = vector.extract_strided_slice %198 {offsets = [0, 256], sizes = [8, 128], strides = [1, 1]} : vector<8x384xf32> to vector<8x128xf32>
    %221 = vector.extract_strided_slice %199 {offsets = [0, 256], sizes = [8, 128], strides = [1, 1]} : vector<8x384xf32> to vector<8x128xf32>
    %222 = arith.addf %221, %13 : vector<8x128xf32>
    %223 = arith.mulf %209, %222 : vector<8x128xf32>
    %224 = arith.addf %220, %223 : vector<8x128xf32>
    %225 = math.tanh %224 : vector<8x128xf32>
    %cst_73 = arith.constant 1.000000e+00 : f32
    %226 = vector.broadcast %cst_73 : f32 to vector<8x128xf32>
    %227 = arith.subf %226, %219 : vector<8x128xf32>
    %228 = arith.mulf %227, %225 : vector<8x128xf32>
    %229 = arith.mulf %219, %194 : vector<8x128xf32>
    %230 = arith.addf %228, %229 : vector<8x128xf32>
    %c6_i32 = arith.constant 6 : i32
    %c8_i32_74 = arith.constant 8 : i32
    %231 = arith.muli %c6_i32, %c8_i32_74 : i32
    %232 = tpu.assume_multiple %231, 8 : i32
    %233 = arith.index_cast %232 : i32 to index
    %c0_75 = arith.constant 0 : index
    %234 = vector.load %arg8[%233, %c0_75] : memref<64x384xf32, #tpu.memory_space<vmem>>, vector<8x384xf32>
    %cst_76 = arith.constant dense<0.000000e+00> : vector<8x384xf32>
    %235 = tpu.matmul %230, %4, %cst_76 {dimension_numbers = #tpu.dot_dimension_numbers<[1], [0], [0], [1], [0, 0, 1, 1], [], []>} : vector<8x128xf32>, vector<128x384xf32>, vector<8x384xf32> -> vector<8x384xf32>
    %236 = vector.extract_strided_slice %234 {offsets = [0, 0], sizes = [8, 128], strides = [1, 1]} : vector<8x384xf32> to vector<8x128xf32>
    %237 = vector.extract_strided_slice %235 {offsets = [0, 0], sizes = [8, 128], strides = [1, 1]} : vector<8x384xf32> to vector<8x128xf32>
    %238 = arith.addf %236, %237 : vector<8x128xf32>
    %cst_77 = arith.constant 5.000000e-01 : f32
    %239 = vector.broadcast %cst_77 : f32 to vector<8x128xf32>
    %240 = arith.mulf %239, %238 : vector<8x128xf32>
    %241 = math.tanh %240 : vector<8x128xf32>
    %cst_78 = arith.constant 5.000000e-01 : f32
    %242 = vector.broadcast %cst_78 : f32 to vector<8x128xf32>
    %243 = arith.mulf %242, %241 : vector<8x128xf32>
    %cst_79 = arith.constant 5.000000e-01 : f32
    %244 = vector.broadcast %cst_79 : f32 to vector<8x128xf32>
    %245 = arith.addf %243, %244 : vector<8x128xf32>
    %246 = vector.extract_strided_slice %234 {offsets = [0, 128], sizes = [8, 128], strides = [1, 1]} : vector<8x384xf32> to vector<8x128xf32>
    %247 = vector.extract_strided_slice %235 {offsets = [0, 128], sizes = [8, 128], strides = [1, 1]} : vector<8x384xf32> to vector<8x128xf32>
    %248 = arith.addf %246, %247 : vector<8x128xf32>
    %cst_80 = arith.constant 5.000000e-01 : f32
    %249 = vector.broadcast %cst_80 : f32 to vector<8x128xf32>
    %250 = arith.mulf %249, %248 : vector<8x128xf32>
    %251 = math.tanh %250 : vector<8x128xf32>
    %cst_81 = arith.constant 5.000000e-01 : f32
    %252 = vector.broadcast %cst_81 : f32 to vector<8x128xf32>
    %253 = arith.mulf %252, %251 : vector<8x128xf32>
    %cst_82 = arith.constant 5.000000e-01 : f32
    %254 = vector.broadcast %cst_82 : f32 to vector<8x128xf32>
    %255 = arith.addf %253, %254 : vector<8x128xf32>
    %256 = vector.extract_strided_slice %234 {offsets = [0, 256], sizes = [8, 128], strides = [1, 1]} : vector<8x384xf32> to vector<8x128xf32>
    %257 = vector.extract_strided_slice %235 {offsets = [0, 256], sizes = [8, 128], strides = [1, 1]} : vector<8x384xf32> to vector<8x128xf32>
    %258 = arith.addf %257, %13 : vector<8x128xf32>
    %259 = arith.mulf %245, %258 : vector<8x128xf32>
    %260 = arith.addf %256, %259 : vector<8x128xf32>
    %261 = math.tanh %260 : vector<8x128xf32>
    %cst_83 = arith.constant 1.000000e+00 : f32
    %262 = vector.broadcast %cst_83 : f32 to vector<8x128xf32>
    %263 = arith.subf %262, %255 : vector<8x128xf32>
    %264 = arith.mulf %263, %261 : vector<8x128xf32>
    %265 = arith.mulf %255, %230 : vector<8x128xf32>
    %266 = arith.addf %264, %265 : vector<8x128xf32>
    %c7_i32 = arith.constant 7 : i32
    %c8_i32_84 = arith.constant 8 : i32
    %267 = arith.muli %c7_i32, %c8_i32_84 : i32
    %268 = tpu.assume_multiple %267, 8 : i32
    %269 = arith.index_cast %268 : i32 to index
    %c0_85 = arith.constant 0 : index
    %270 = vector.load %arg8[%269, %c0_85] : memref<64x384xf32, #tpu.memory_space<vmem>>, vector<8x384xf32>
    %cst_86 = arith.constant dense<0.000000e+00> : vector<8x384xf32>
    %271 = tpu.matmul %266, %4, %cst_86 {dimension_numbers = #tpu.dot_dimension_numbers<[1], [0], [0], [1], [0, 0, 1, 1], [], []>} : vector<8x128xf32>, vector<128x384xf32>, vector<8x384xf32> -> vector<8x384xf32>
    %272 = vector.extract_strided_slice %270 {offsets = [0, 0], sizes = [8, 128], strides = [1, 1]} : vector<8x384xf32> to vector<8x128xf32>
    %273 = vector.extract_strided_slice %271 {offsets = [0, 0], sizes = [8, 128], strides = [1, 1]} : vector<8x384xf32> to vector<8x128xf32>
    %274 = arith.addf %272, %273 : vector<8x128xf32>
    %cst_87 = arith.constant 5.000000e-01 : f32
    %275 = vector.broadcast %cst_87 : f32 to vector<8x128xf32>
    %276 = arith.mulf %275, %274 : vector<8x128xf32>
    %277 = math.tanh %276 : vector<8x128xf32>
    %cst_88 = arith.constant 5.000000e-01 : f32
    %278 = vector.broadcast %cst_88 : f32 to vector<8x128xf32>
    %279 = arith.mulf %278, %277 : vector<8x128xf32>
    %cst_89 = arith.constant 5.000000e-01 : f32
    %280 = vector.broadcast %cst_89 : f32 to vector<8x128xf32>
    %281 = arith.addf %279, %280 : vector<8x128xf32>
    %282 = vector.extract_strided_slice %270 {offsets = [0, 128], sizes = [8, 128], strides = [1, 1]} : vector<8x384xf32> to vector<8x128xf32>
    %283 = vector.extract_strided_slice %271 {offsets = [0, 128], sizes = [8, 128], strides = [1, 1]} : vector<8x384xf32> to vector<8x128xf32>
    %284 = arith.addf %282, %283 : vector<8x128xf32>
    %cst_90 = arith.constant 5.000000e-01 : f32
    %285 = vector.broadcast %cst_90 : f32 to vector<8x128xf32>
    %286 = arith.mulf %285, %284 : vector<8x128xf32>
    %287 = math.tanh %286 : vector<8x128xf32>
    %cst_91 = arith.constant 5.000000e-01 : f32
    %288 = vector.broadcast %cst_91 : f32 to vector<8x128xf32>
    %289 = arith.mulf %288, %287 : vector<8x128xf32>
    %cst_92 = arith.constant 5.000000e-01 : f32
    %290 = vector.broadcast %cst_92 : f32 to vector<8x128xf32>
    %291 = arith.addf %289, %290 : vector<8x128xf32>
    %292 = vector.extract_strided_slice %270 {offsets = [0, 256], sizes = [8, 128], strides = [1, 1]} : vector<8x384xf32> to vector<8x128xf32>
    %293 = vector.extract_strided_slice %271 {offsets = [0, 256], sizes = [8, 128], strides = [1, 1]} : vector<8x384xf32> to vector<8x128xf32>
    %294 = arith.addf %293, %13 : vector<8x128xf32>
    %295 = arith.mulf %281, %294 : vector<8x128xf32>
    %296 = arith.addf %292, %295 : vector<8x128xf32>
    %297 = math.tanh %296 : vector<8x128xf32>
    %cst_93 = arith.constant 1.000000e+00 : f32
    %298 = vector.broadcast %cst_93 : f32 to vector<8x128xf32>
    %299 = arith.subf %298, %291 : vector<8x128xf32>
    %300 = arith.mulf %299, %297 : vector<8x128xf32>
    %301 = arith.mulf %291, %266 : vector<8x128xf32>
    %302 = arith.addf %300, %301 : vector<8x128xf32>
    %c8_i32_94 = arith.constant 8 : i32
    %c0_95 = arith.constant 0 : index
    %c0_96 = arith.constant 0 : index
    %303 = vector.load %arg7[%c0_95, %c0_96] : memref<8x128xf32, #tpu.memory_space<vmem>>, vector<8x128xf32>
    tpu.vector_store %arg7[%c0_95, %c0_96], %302 {strides = array<i32>} : memref<8x128xf32, #tpu.memory_space<vmem>>, vector<8x128xf32>,
    return
  }
  func.func @transform_0(%arg0: i32, %arg1: i32) -> (i32, i32) {
    %c1_i32 = arith.constant 1 : i32
    %0 = arith.muli %arg0, %c1_i32 : i32
    %1 = arith.addi %0, %arg1 : i32
    %c0_i32 = arith.constant 0 : i32
    %c0_i32_0 = arith.constant 0 : i32
    return %1, %c0_i32 : i32, i32
  }
  func.func @transform_1(%arg0: i32, %arg1: i32) -> (i32, i32) {
    %c0_i32 = arith.constant 0 : i32
    %c0_i32_0 = arith.constant 0 : i32
    %c0_i32_1 = arith.constant 0 : i32
    return %c0_i32, %c0_i32_0 : i32, i32
  }
  func.func @transform_2(%arg0: i32, %arg1: i32) -> (i32, i32) {
    %c0_i32 = arith.constant 0 : i32
    %c0_i32_0 = arith.constant 0 : i32
    %c0_i32_1 = arith.constant 0 : i32
    return %c0_i32, %c0_i32_0 : i32, i32
  }
  func.func @transform_3(%arg0: i32, %arg1: i32) -> (i32, i32) {
    %c0_i32 = arith.constant 0 : i32
    %c0_i32_0 = arith.constant 0 : i32
    %c0_i32_1 = arith.constant 0 : i32
    return %c0_i32, %c0_i32_0 : i32, i32
  }
  func.func @transform_4(%arg0: i32, %arg1: i32) -> (i32, i32) {
    %c0_i32 = arith.constant 0 : i32
    %c0_i32_0 = arith.constant 0 : i32
    %c0_i32_1 = arith.constant 0 : i32
    return %c0_i32, %c0_i32_0 : i32, i32
  }
  func.func @transform_5(%arg0: i32, %arg1: i32) -> (i32, i32) {
    %c0_i32 = arith.constant 0 : i32
    %c0_i32_0 = arith.constant 0 : i32
    return %arg0, %c0_i32 : i32, i32
  }
}

</mosaic_0001>

<bundles_post_ra>
// kernel: gru_model_forward.1
= control target key start
LH: loop header
LB: loop body
LE: loop exit
PB: predicated region body
PF: predicated region fallthrough
CT: control target
= control target key end

     0   :  { %v2836_v3 = vmov 0.0   ;;  %vm2838_vm0 = vmmov 0   ;;  %s3583_s1 = inlined_call_operand.vmem [shape: f32[128,384], index: 1, kind: input, shape index: {}]   ;;  %s3584_s0 = inlined_call_operand.vmem [shape: f32[64,128], index: 0, kind: input, shape index: {}]   ;;  %s3585_s3 = inlined_call_operand.vmem [shape: f32[128,384], index: 3, kind: input, shape index: {}]   ;;  %s3586_s2 = inlined_call_operand.vmem [shape: f32[1,384], index: 2, kind: input, shape index: {}]   ;;  %s3587_s4 = inlined_call_operand.vmem [shape: f32[1,128], index: 4, kind: input, shape index: {}]   ;;  %s3588_s5 = inlined_call_operand.vmem [shape: f32[8,128], index: 5, kind: output, shape index: {}]  }
   0x1   :  { %v48_v0 = vld [vmem:[%s3583_s1 + $0x8] sm:$0xff]  ;;  %v51_v1 = vld [vmem:[%s3583_s1 + $0x20] sm:$0xff]  ;;  %232 = vmatprep.mubr.f32.mxu0 %v2836_v3  ;;  %v50_v5 = vld [vmem:[%s3583_s1 + $0x18] sm:$0xff] }
   0x2   :  { %v47_v2 = vld [vmem:[%s3583_s1] sm:$0xff]  ;;  %v2241_v4 = vpack.c.bf16 %v51_v1, %v48_v0  ;;  %v54_v6 = vld [vmem:[%s3583_s1 + $0x38] sm:$0xff]  ;;  %v57_v7 = vld [vmem:[%s3583_s1 + $0x50] sm:$0xff] }
   0x3   :  { %v2243_v8 = vpack.c.bf16 %v50_v5, %v47_v2  ;;  %v2245_v9 = vpack.c.bf16 %v57_v7, %v54_v6  ;;  %v53_v10 = vld [vmem:[%s3583_s1 + $0x30] sm:$0xff]  ;;  %v56_v11 = vld [vmem:[%s3583_s1 + $0x48] sm:$0xff]  ;;  %v63_v13 = vld [vmem:[%s3583_s1 + $0x80] sm:$0xff] }
   0x4   :  { %v60_v12 = vld [vmem:[%s3583_s1 + $0x68] sm:$0xff]  ;;  %2242 = vmatprep.subr.bf16.mxu0 %v2241_v4  ;;  %v2247_v14 = vpack.c.bf16 %v56_v11, %v53_v10  ;;  %v59_v16 = vld [vmem:[%s3583_s1 + $0x60] sm:$0xff]  ;;  %v62_v17 = vld [vmem:[%s3583_s1 + $0x78] sm:$0xff] }
   0x5   :  { %2244 = vmatpush1.bf16.msra.mxu0 %v2243_v8  ;;  %v2249_v15 = vpack.c.bf16 %v63_v13, %v60_v12  ;;  %v66_v18 = vld [vmem:[%s3583_s1 + $0x98] sm:$0xff]  ;;  %v69_v19 = vld [vmem:[%s3583_s1 + $0xb0] sm:$0xff]  ;;  %v52_v21 = vld [vmem:[%s3583_s1 + $0x28] sm:$0xff]  ;;  %v2251_v22 = vpack.c.bf16 %v62_v17, %v59_v16 }
   0x6   :  { %2246 = vmatprep.subr.bf16.mxu0 %v2245_v9  ;;  %v49_v20 = vld [vmem:[%s3583_s1 + $0x10] sm:$0xff]  ;;  %v55_v24 = vld [vmem:[%s3583_s1 + $0x40] sm:$0xff]  ;;  %v2253_v25 = vpack.c.bf16 %v69_v19, %v66_v18  ;;  %v68_v27 = vld [vmem:[%s3583_s1 + $0xa8] sm:$0xff] }
   0x7   :  { %v2273_v23 = vpack.c.bf16 %v52_v21, %v49_v20  ;;  %v65_v26 = vld [vmem:[%s3583_s1 + $0x90] sm:$0xff]  ;;  %v58_v28 = vld [vmem:[%s3583_s1 + $0x58] sm:$0xff]  ;;  %v72_v29 = vld [vmem:[%s3583_s1 + $0xc8] sm:$0xff] }
   0x8   :  { %v75_v30 = vld [vmem:[%s3583_s1 + $0xe0] sm:$0xff]  ;;  %v2277_v31 = vpack.c.bf16 %v58_v28, %v55_v24  ;;  %v61_v32 = vld [vmem:[%s3583_s1 + $0x70] sm:$0xff]  ;;  %v64_v33 = vld [vmem:[%s3583_s1 + $0x88] sm:$0xff]  ;;  %v2255_v34 = vpack.c.bf16 %v68_v27, %v65_v26 }
   0x9   :  { %2248 = vmatpush1.bf16.msra.mxu0 %v2247_v14  ;;  %2274 = vmatprep.subr.bf16.mxu1 %v2273_v23  ;;  %v71_v35 = vld [vmem:[%s3583_s1 + $0xc0] sm:$0xff]  ;;  %v74_v36 = vld [vmem:[%s3583_s1 + $0xd8] sm:$0xff]  ;;  %v2281_v37 = vpack.c.bf16 %v64_v33, %v61_v32  ;;  %v2257_v38 = vpack.c.bf16 %v75_v30, %v72_v29  ;;  %v81_v43 = vld [vmem:[%s3583_s1 + $0x110] sm:$0xff] }
   0xa   :  { %2250 = vmatprep.subr.bf16.mxu0 %v2249_v15  ;;  %2276 = vmatpush3.bf16.msra.mxu1 %v2273_v23  ;;  %v67_v39 = vld [vmem:[%s3583_s1 + $0xa0] sm:$0xff]  ;;  %v70_v40 = vld [vmem:[%s3583_s1 + $0xb8] sm:$0xff]  ;;  %v2259_v44 = vpack.c.bf16 %v74_v36, %v71_v35  ;;  %v77_v45 = vld [vmem:[%s3583_s1 + $0xf0] sm:$0xff] }
   0xb   :  { %2278 = vmatprep.subr.bf16.mxu1 %v2277_v31  ;;  %v2957_v41 = vld [vmem:[%s3584_s0] sm:$0xff]  ;;  %v78_v42 = vld [vmem:[%s3583_s1 + $0xf8] sm:$0xff]  ;;  %v2285_v46 = vpack.c.bf16 %v70_v40, %v67_v39  ;;  %v80_v48 = vld [vmem:[%s3583_s1 + $0x108] sm:$0xff] }
   0xc   :  { %1949 = vmatprep.mubr.f32.mxu1 %v2957_v41  ;;  %v2261_v47 = vpack.c.bf16 %v81_v43, %v78_v42  ;;  %v73_v49 = vld [vmem:[%s3583_s1 + $0xd0] sm:$0xff]  ;;  %v76_v50 = vld [vmem:[%s3583_s1 + $0xe8] sm:$0xff]  ;;  %v87_v52 = vld [vmem:[%s3583_s1 + $0x140] sm:$0xff]  ;;  %v2263_v53 = vpack.c.bf16 %v80_v48, %v77_v45 }
   0xd   :  { %2252 = vmatpush1.bf16.msra.mxu0 %v2251_v22  ;;  %v84_v51 = vld [vmem:[%s3583_s1 + $0x128] sm:$0xff]  ;;  %v83_v54 = vld [vmem:[%s3583_s1 + $0x120] sm:$0xff]  ;;  %v2289_v55 = vpack.c.bf16 %v76_v50, %v73_v49  ;;  %v86_v57 = vld [vmem:[%s3583_s1 + $0x138] sm:$0xff] }
   0xe   :  { %2254 = vmatprep.subr.bf16.mxu0 %v2253_v25  ;;  %2280 = vmatpush3.bf16.msra.mxu1 %v2277_v31  ;;  %v2265_v56 = vpack.c.bf16 %v87_v52, %v84_v51  ;;  %v79_v58 = vld [vmem:[%s3583_s1 + $0x100] sm:$0xff]  ;;  %v82_v59 = vld [vmem:[%s3583_s1 + $0x118] sm:$0xff]  ;;  %v93_v61 = vld [vmem:[%s3583_s1 + $0x170] sm:$0xff]  ;;  %v2267_v62 = vpack.c.bf16 %v86_v57, %v83_v54 }
   0xf   :  { %2282 = vmatprep.subr.bf16.mxu1 %v2281_v37  ;;  %v90_v60 = vld [vmem:[%s3583_s1 + $0x158] sm:$0xff]  ;;  %v89_v63 = vld [vmem:[%s3583_s1 + $0x150] sm:$0xff]  ;;  %v2293_v0 = vpack.c.bf16 %v82_v59, %v79_v58  ;;  %v92_v2 = vld [vmem:[%s3583_s1 + $0x168] sm:$0xff] }
  0x10   :  { %v2269_v1 = vpack.c.bf16 %v93_v61, %v90_v60  ;;  %v85_v4 = vld [vmem:[%s3583_s1 + $0x130] sm:$0xff]  ;;  %v88_v5 = vld [vmem:[%s3583_s1 + $0x148] sm:$0xff]  ;;  %v99_v7 = vld [vmem:[%s3585_s3 + $0x20] sm:$0xff]  ;;  %v2271_v8 = vpack.c.bf16 %v92_v2, %v89_v63 }
  0x11   :  { %2256 = vmatpush1.bf16.msra.mxu0 %v2255_v34  ;;  %v96_v6 = vld [vmem:[%s3585_s3 + $0x8] sm:$0xff]  ;;  %v2297_v9 = vpack.c.bf16 %v88_v5, %v85_v4  ;;  %v95_v11 = vld [vmem:[%s3585_s3] sm:$0xff]  ;;  %v98_v12 = vld [vmem:[%s3585_s3 + $0x18] sm:$0xff] }
  0x12   :  { %2258 = vmatprep.subr.bf16.mxu0 %v2257_v38  ;;  %2284 = vmatpush3.bf16.msra.mxu1 %v2281_v37  ;;  %v3020_v10 = vpack.c.bf16 %v99_v7, %v96_v6  ;;  %v102_v13 = vld [vmem:[%s3585_s3 + $0x38] sm:$0xff]  ;;  %v105_v14 = vld [vmem:[%s3585_s3 + $0x50] sm:$0xff]  ;;  %v91_v15 = vld [vmem:[%s3583_s1 + $0x160] sm:$0xff]  ;;  %v3040_v17 = vpack.c.bf16 %v98_v12, %v95_v11 }
  0x13   :  { %2286 = vmatprep.subr.bf16.mxu1 %v2285_v46  ;;  %v94_v16 = vld [vmem:[%s3583_s1 + $0x178] sm:$0xff]  ;;  %v3043_v18 = vpack.c.bf16 %v105_v14, %v102_v13  ;;  %v101_v19 = vld [vmem:[%s3585_s3 + $0x30] sm:$0xff]  ;;  %v104_v20 = vld [vmem:[%s3585_s3 + $0x48] sm:$0xff] }
  0x14   :  { %v2301_v21 = vpack.c.bf16 %v94_v16, %v91_v15  ;;  %v108_v22 = vld [vmem:[%s3585_s3 + $0x68] sm:$0xff]  ;;  %v111_v23 = vld [vmem:[%s3585_s3 + $0x80] sm:$0xff]  ;;  %v3063_v25 = vpack.c.bf16 %v104_v20, %v101_v19  ;;  %v97_v26 = vld [vmem:[%s3585_s3 + $0x10] sm:$0xff] }
  0x15   :  { %2260 = vmatpush1.bf16.msra.mxu0 %v2259_v44  ;;  %v144_v24 = vld [vmem:[%s3584_s0 + $0x8] sm:$0xff]  ;;  %v3072_v28 = vpack.c.bf16 %v111_v23, %v108_v22  ;;  %v107_v29 = vld [vmem:[%s3585_s3 + $0x60] sm:$0xff]  ;;  %v110_v30 = vld [vmem:[%s3585_s3 + $0x78] sm:$0xff] }
  0x16   :  { %2262 = vmatprep.subr.bf16.mxu0 %v2261_v47  ;;  %2288 = vmatpush3.bf16.msra.mxu1 %v2285_v46  ;;  %v100_v27 = vld [vmem:[%s3585_s3 + $0x28] sm:$0xff]  ;;  %v114_v31 = vld [vmem:[%s3585_s3 + $0x98] sm:$0xff]  ;;  %v117_v32 = vld [vmem:[%s3585_s3 + $0xb0] sm:$0xff]  ;;  %v3093_v35 = vpack.c.bf16 %v110_v30, %v107_v29 }
  0x17   :  { %2290 = vmatprep.subr.bf16.mxu1 %v2289_v55  ;;  %v3086_v33 = vpack.c.bf16 %v100_v27, %v97_v26  ;;  %v145_v34 = vld [vmem:[%s3584_s0 + $0x10] sm:$0xff]  ;;  %v103_v36 = vld [vmem:[%s3585_s3 + $0x40] sm:$0xff]  ;;  %v106_v37 = vld [vmem:[%s3585_s3 + $0x58] sm:$0xff]  ;;  %v3102_v38 = vpack.c.bf16 %v117_v32, %v114_v31 }
  0x18   :  { %v113_v39 = vld [vmem:[%s3585_s3 + $0x90] sm:$0xff]  ;;  %v116_v40 = vld [vmem:[%s3585_s3 + $0xa8] sm:$0xff]  ;;  %v123_v43 = vld [vmem:[%s3585_s3 + $0xe0] sm:$0xff]  ;;  %v3118_v44 = vpack.c.bf16 %v106_v37, %v103_v36 }
  0x19   :  { %2264 = vmatpush1.bf16.msra.mxu0 %v2263_v53  ;;  %v120_v42 = vld [vmem:[%s3585_s3 + $0xc8] sm:$0xff]  ;;  %v146_v45 = vld [vmem:[%s3584_s0 + $0x18] sm:$0xff]  ;;  %v3125_v46 = vpack.c.bf16 %v116_v40, %v113_v39  ;;  %v109_v47 = vld [vmem:[%s3585_s3 + $0x70] sm:$0xff] }
  0x1a   :  { %2266 = vmatprep.subr.bf16.mxu0 %v2265_v56  ;;  %2292 = vmatpush3.bf16.msra.mxu1 %v2289_v55  ;;  %v112_v48 = vld [vmem:[%s3585_s3 + $0x88] sm:$0xff]  ;;  %v3134_v49 = vpack.c.bf16 %v123_v43, %v120_v42  ;;  %v119_v50 = vld [vmem:[%s3585_s3 + $0xc0] sm:$0xff]  ;;  %v122_v51 = vld [vmem:[%s3585_s3 + $0xd8] sm:$0xff] }
  0x1b   :  { %2294 = vmatprep.subr.bf16.mxu1 %v2293_v0  ;;  %v126_v52 = vld [vmem:[%s3585_s3 + $0xf8] sm:$0xff]  ;;  %v129_v53 = vld [vmem:[%s3585_s3 + $0x110] sm:$0xff]  ;;  %v3150_v54 = vpack.c.bf16 %v112_v48, %v109_v47  ;;  %v147_v55 = vld [vmem:[%s3584_s0 + $0x20] sm:$0xff]  ;;  %v3157_v56 = vpack.c.bf16 %v122_v51, %v119_v50 }
  0x1c   :  { %v115_v57 = vld [vmem:[%s3585_s3 + $0xa0] sm:$0xff]  ;;  %v118_v58 = vld [vmem:[%s3585_s3 + $0xb8] sm:$0xff]  ;;  %v3166_v59 = vpack.c.bf16 %v129_v53, %v126_v52  ;;  %v125_v60 = vld [vmem:[%s3585_s3 + $0xf0] sm:$0xff] }
  0x1d   :  { %2268 = vmatpush1.bf16.msra.mxu0 %v2267_v62  ;;  %v128_v61 = vld [vmem:[%s3585_s3 + $0x108] sm:$0xff]  ;;  %v135_v63 = vld [vmem:[%s3585_s3 + $0x140] sm:$0xff]  ;;  %v121_v4 = vld [vmem:[%s3585_s3 + $0xd0] sm:$0xff] }
  0x1e   :  { %2270 = vmatprep.subr.bf16.mxu0 %v2269_v1  ;;  %2296 = vmatpush3.bf16.msra.mxu1 %v2293_v0  ;;  %v132_v62 = vld [vmem:[%s3585_s3 + $0x128] sm:$0xff]  ;;  %v3182_v0 = vpack.c.bf16 %v118_v58, %v115_v57  ;;  %v3189_v2 = vpack.c.bf16 %v128_v61, %v125_v60  ;;  %v131_v7 = vld [vmem:[%s3585_s3 + $0x120] sm:$0xff]  ;;  %v141_v11 = vld [vmem:[%s3585_s3 + $0x170] sm:$0xff] }
  0x1f   :  { %2298 = vmatprep.subr.bf16.mxu1 %v2297_v9  ;;  %v148_v1 = vld [vmem:[%s3584_s0 + $0x28] sm:$0xff]  ;;  %v3198_v6 = vpack.c.bf16 %v135_v63, %v132_v62  ;;  %v149_v13 = vld [vmem:[%s3584_s0 + $0x30] sm:$0xff]  ;;  %v127_v15 = vld [vmem:[%s3585_s3 + $0x100] sm:$0xff] }
  0x20   :  { %v124_v5 = vld [vmem:[%s3585_s3 + $0xe8] sm:$0xff]  ;;  %v130_v16 = vld [vmem:[%s3585_s3 + $0x118] sm:$0xff]  ;;  %v137_v20 = vld [vmem:[%s3585_s3 + $0x150] sm:$0xff] }
  0x21   :  { %2272 = vmatpush1.bf16.msra.mxu0 %v2271_v8  ;;  %v134_v8 = vld [vmem:[%s3585_s3 + $0x138] sm:$0xff]  ;;  %v3214_v12 = vpack.c.bf16 %v124_v5, %v121_v4  ;;  %v3240_v22 = vpack.c.bf16 %v130_v16, %v127_v15  ;;  %v133_v26 = vld [vmem:[%s3585_s3 + $0x130] sm:$0xff]  ;;  %v136_v27 = vld [vmem:[%s3585_s3 + $0x148] sm:$0xff] }
  0x22   :  { %2306 = vmatprep.subr.bf16.mxu0 %v3020_v10  ;;  %2300 = vmatpush3.bf16.msra.mxu1 %v2297_v9  ;;  %v138_v9 = vld [vmem:[%s3585_s3 + $0x158] sm:$0xff]  ;;  %v3221_v14 = vpack.c.bf16 %v134_v8, %v131_v7  ;;  %v3258_v29 = vpack.c.bf16 %v136_v27, %v133_v26  ;;  %v139_v30 = vld [vmem:[%s3585_s3 + $0x160] sm:$0xff] }
  0x23   :  { %2302 = vmatprep.subr.bf16.mxu1 %v2301_v21  ;;  %v3230_v19 = vpack.c.bf16 %v141_v11, %v138_v9  ;;  %v150_v23 = vld [vmem:[%s3584_s0 + $0x38] sm:$0xff]  ;;  %v151_v39 = vld [vmem:[%s3586_s2] sm:$0x7] }
  0x24   :  { %233 = vmatmul.mubr.f32.vlgmr.msra.gmra.mrb[0].mxu0 %v2957_v41  ;;  %v2837_v41 = vmov 0.0|0.0   ;;  %v142_v31 = vld [vmem:[%s3585_s3 + $0x178] sm:$0xff] }
  0x25   :  { %2308 = vmatpush1.bf16.msra.mxu0 %v3040_v17  ;;  %238 = vmatprep.mubr.f32.mxu0 %v2836_v3  ;;  %v3274_v32 = vpack.c.bf16 %v142_v31, %v139_v30 }
  0x26   :  { %2310 = vmatprep.subr.bf16.mxu0 %v3043_v18  ;;  %2304 = vmatpush3.bf16.msra.mxu1 %v2301_v21  ;;  %v140_v21 = vld [vmem:[%s3585_s3 + $0x168] sm:$0xff] }
  0x27   :  { %2337 = vmatprep.subr.bf16.mxu1 %v2837_v41 }
  0x28   :  { %239 = vmatmul.mubr.f32.gmra.mrb[2].mxu0 %v144_v24 }
  0x29   :  { %2312 = vmatpush1.bf16.msra.mxu0 %v3063_v25  ;;  %244 = vmatprep.mubr.f32.mxu0 %v2836_v3 }
  0x2a   :  { %2314 = vmatprep.subr.bf16.mxu0 %v3072_v28  ;;  %1950 = vmatmul.mubr.f32.vlgmr.msra.gmra.mrb[0].mxu1 %v144_v24  ;;  %v3247_v24 = vpack.c.bf16 %v140_v21, %v137_v20  ;;  %v3341_v21 = vld [vmem:[%s3587_s4] ss:$0 sm:$0xff] }
  0x2b   :  { %2339 = vmatpush3.bf16.msra.mxu1 %v3086_v33  ;;  %1952 = vmatprep.mubr.f32.mxu1 %v145_v34 }
  0x2c   :  { %245 = vmatmul.mubr.f32.gmra.mrb[4].mxu0 %v145_v34  ;;  %2340 = vmatprep.subr.bf16.mxu1 %v2837_v41  ;;  %v153_v34 = vlaneseq }
  0x2d   :  { %2316 = vmatpush1.bf16.msra.mxu0 %v3093_v35  ;;  %250 = vmatprep.mubr.f32.mxu0 %v2836_v3 }
  0x2e   :  { %2318 = vmatprep.subr.bf16.mxu0 %v3102_v38  ;;  %1953 = vmatmul.mubr.f32.gmra.mrb[2].mxu1 %v146_v45  ;;  %v154_v36 = vshrl.u32 %v153_v34, 7 }
  0x2f   :  { %2342 = vmatpush3.bf16.msra.mxu1 %v3118_v44  ;;  %1955 = vmatprep.mubr.f32.mxu1 %v147_v55 }
  0x30   :  { %251 = vmatmul.mubr.f32.gmra.mrb[6].mxu0 %v146_v45  ;;  %2343 = vmatprep.subr.bf16.mxu1 %v2837_v41  ;;  %v163_v37 = vsub.s32 2, %v154_v36  ;;  %v155_v57 = vsub.s32 0, %v154_v36  ;;  %v159_v60 = vsub.s32 1, %v154_v36 }
  0x31   :  { %2320 = vmatpush1.bf16.msra.mxu0 %v3125_v46  ;;  %256 = vmatprep.mubr.f32.mxu0 %v2836_v3 }
  0x32   :  { %2322 = vmatprep.subr.bf16.mxu0 %v3134_v49  ;;  %1956 = vmatmul.mubr.f32.gmra.mrb[4].mxu1 %v148_v1  ;;  %v164_v40 = vrot.slane %v151_v39, %v163_v37  ;;  %v3328_v61 = vrot.slane %v151_v39, %v155_v57  ;;  %v3332_v5 = vrot.slane %v151_v39, %v159_v60 }
  0x33   :  { %2345 = vmatpush3.bf16.msra.mxu1 %v3150_v54  ;;  %1958 = vmatprep.mubr.f32.mxu1 %v149_v13 }
  0x34   :  { %257 = vmatmul.mubr.f32.gmra.mrb[8].mxu0 %v147_v55  ;;  %2346 = vmatprep.subr.bf16.mxu1 %v2837_v41 }
  0x35   :  { %2324 = vmatpush1.bf16.msra.mxu0 %v3157_v56  ;;  %262 = vmatprep.mubr.f32.mxu0 %v2836_v3 }
  0x36   :  { %2326 = vmatprep.subr.bf16.mxu0 %v3166_v59  ;;  %1959 = vmatmul.mubr.f32.gmra.mrb[6].mxu1 %v150_v23 }
  0x37   :  { %2348 = vmatpush3.bf16.msra.mxu1 %v3182_v0  ;;  %1993 = vmatprep.mubr.msk.f32.mxu1 %vm2838_vm0, %v2836_v3 }
  0x38   :  { %263 = vmatmul.mubr.f32.gmra.mrb[10].mxu0 %v148_v1  ;;  %2349 = vmatprep.subr.bf16.mxu1 %v2837_v41 }
  0x39   :  { %2328 = vmatpush1.bf16.msra.mxu0 %v3189_v2  ;;  %268 = vmatprep.mubr.f32.mxu0 %v2836_v3 }
  0x3a   :  { %2330 = vmatprep.subr.bf16.mxu0 %v3198_v6 }
  0x3b   :  { %2351 = vmatpush3.bf16.msra.mxu1 %v3214_v12 }
  0x3c   :  { %269 = vmatmul.mubr.f32.gmra.mrb[12].mxu0 %v149_v13  ;;  %2352 = vmatprep.subr.bf16.mxu1 %v2837_v41 }
  0x3d   :  { %2332 = vmatpush1.bf16.msra.mxu0 %v3221_v14  ;;  %274 = vmatprep.mubr.f32.mxu0 %v2836_v3 }
  0x3e   :  { %2334 = vmatprep.subr.bf16.mxu0 %v3230_v19 }
  0x3f   :  { %2354 = vmatpush3.bf16.msra.mxu1 %v3240_v22 }
  0x40   :  { %275 = vmatmul.mubr.f32.gmra.mrb[14].mxu0 %v150_v23  ;;  %2355 = vmatprep.subr.bf16.mxu1 %v2837_v41 }
  0x41   :  { %2336 = vmatpush1.bf16.msra.mxu0 %v3247_v24  ;;  %488 = vmatprep.mubr.f32.mxu0 %v2836_v3 }
  0x42   :  { %2362 = vmatprep.subr.bf16.mxu0 %v3020_v10 }
  0x43   :  { %2357 = vmatpush3.bf16.msra.mxu1 %v3258_v29 }
  0x44   :  { %489 = vmatmul.mubr.f32.vlgmr.msra.gmra.mrb[0].mxu0 %v2836_v3  ;;  %2358 = vmatprep.subr.bf16.mxu1 %v2837_v41 }
  0x45   :  { %2364 = vmatpush1.bf16.msra.mxu0 %v3040_v17  ;;  %653 = vmatprep.mubr.f32.mxu0 %v2836_v3 }
  0x46   :  { %2366 = vmatprep.subr.bf16.mxu0 %v3043_v18 }
  0x47   :  { %2360 = vmatpush3.bf16.msra.mxu1 %v3274_v32 }
  0x48   :  { %2393 = vmatprep.subr.bf16.mxu1 %v2837_v41 }
  0x49   :  { %2368 = vmatpush1.bf16.msra.mxu0 %v3063_v25 }
  0x4a   :  { %2370 = vmatprep.subr.bf16.mxu0 %v3072_v28  ;;  %1994 = vmatmul.mubr.f32.vlgmr.msra.gmra.mrb[8].mxu1 %v2836_v3 }
  0x4b   :  { %2395 = vmatpush3.bf16.msra.mxu1 %v3086_v33  ;;  %2028 = vmatprep.mubr.msk.f32.mxu1 %vm2838_vm0, %v2836_v3 }
  0x4c   :  { %2396 = vmatprep.subr.bf16.mxu1 %v2837_v41 }
  0x4d   :  { %2372 = vmatpush1.bf16.msra.mxu0 %v3093_v35 }
  0x4e   :  { %2374 = vmatprep.subr.bf16.mxu0 %v3102_v38 }
  0x4f   :  { %2398 = vmatpush3.bf16.msra.mxu1 %v3118_v44 }
  0x50   :  { %2399 = vmatprep.subr.bf16.mxu1 %v2837_v41 }
  0x51   :  { %2376 = vmatpush1.bf16.msra.mxu0 %v3125_v46 }
  0x52   :  { %2378 = vmatprep.subr.bf16.mxu0 %v3134_v49 }
  0x53   :  { %2401 = vmatpush3.bf16.msra.mxu1 %v3150_v54 }
  0x54   :  { %2402 = vmatprep.subr.bf16.mxu1 %v2837_v41 }
  0x55   :  { %2380 = vmatpush1.bf16.msra.mxu0 %v3157_v56 }
  0x56   :  { %2382 = vmatprep.subr.bf16.mxu0 %v3166_v59 }
  0x57   :  { %2404 = vmatpush3.bf16.msra.mxu1 %v3182_v0 }
  0x58   :  { %2405 = vmatprep.subr.bf16.mxu1 %v2837_v41 }
  0x59   :  { %2384 = vmatpush1.bf16.msra.mxu0 %v3189_v2 }
  0x5a   :  { %2386 = vmatprep.subr.bf16.mxu0 %v3198_v6 }
  0x5b   :  { %2407 = vmatpush3.bf16.msra.mxu1 %v3214_v12 }
  0x5c   :  { %2408 = vmatprep.subr.bf16.mxu1 %v2837_v41 }
  0x5d   :  { %2388 = vmatpush1.bf16.msra.mxu0 %v3221_v14 }
  0x5e   :  { %2390 = vmatprep.subr.bf16.mxu0 %v3230_v19 }
  0x5f   :  { %2410 = vmatpush3.bf16.msra.mxu1 %v3240_v22 }
  0x60   :  { %2411 = vmatprep.subr.bf16.mxu1 %v2837_v41 }
  0x61   :  { %2392 = vmatpush1.bf16.msra.mxu0 %v3247_v24 }
  0x62   :  { %2418 = vmatprep.subr.bf16.mxu0 %v3020_v10 }
  0x63   :  { %2413 = vmatpush3.bf16.msra.mxu1 %v3258_v29 }
  0x64   :  { %2414 = vmatprep.subr.bf16.mxu1 %v2837_v41 }
  0x67   :  { %2416 = vmatpush3.bf16.msra.mxu1 %v3274_v32 }
  0x68   :  { %2449 = vmatprep.subr.bf16.mxu1 %v2837_v41 }
  0xfd   :  { %v1951_v42 = vpop.f32.mrb[0].mxu1 }
  0xfe   :  { %v3318_v43 = vadd.f32 %v1951_v42, %v164_v40  ;;  %v347_v45 = vpop.f32.mrb[1].mxu1 }
  0xff   :  { %v348_v31 = vadd.f32 %v347_v45, %v164_v40 }
 0x101   :  { %v1954_v47 = vpop.f32.mrb[2].mxu1 }
 0x102   :  { %v3320_v48 = vadd.f32 %v1954_v47, %v164_v40  ;;  %v357_v50 = vpop.f32.mrb[3].mxu1 }
 0x103   :  { %v3322_v51 = vadd.f32 %v357_v50, %v164_v40 }
 0x105   :  { %v1957_v52 = vpop.f32.mrb[4].mxu1 }
 0x106   :  { %v3324_v53 = vadd.f32 %v1957_v52, %v164_v40  ;;  %v367_v55 = vpop.f32.mrb[5].mxu1 }
 0x107   :  { %v3326_v58 = vadd.f32 %v367_v55, %v164_v40 }
 0x109   :  { %v1960_v62 = vpop.f32.mrb[6].mxu1 }
 0x10a   :  { %v3330_v63 = vadd.f32 %v1960_v62, %v164_v40  ;;  %v377_v1 = vpop.f32.mrb[7].mxu1 }
 0x10b   :  { %v3334_v7 = vadd.f32 %v377_v1, %v164_v40 }
 0x117   :  { %v490_v4 = vpop.f32.mrb[0].mxu0 }
 0x118   :  { %v2753_v8 = vadd.f32 %v490_v4, %v3328_v61  ;;  %v492_v9 = vpop.f32.mrb[1].mxu0 }
 0x119   :  { %v2754_v13 = vadd.f32 %v492_v9, %v3332_v5 }
 0x11a   :  { %v566_v11 = vmul.f32 0.5, %v2753_v8 }
 0x11b   :  { %v571_v16 = vmul.f32 0.5, %v2754_v13 }
 0x11c   :  { %2788 = vtanh.f32 %v566_v11 }
 0x11d   :  { %v561_v15 = vpop.f32.mrb[8].mxu1  ;;  %2790 = vtanh.f32 %v571_v16 }
 0x11e   :  { %v1995_v20 = vpop.f32.mrb[9].mxu1  ;;  %v575_v27 = vadd.f32 %v3341_v21, %v561_v15 }
 0x126   :  { %v2789_v23 = vpop.eup %2788 }
 0x127   :  { %v568_v26 = vmul.f32 0.5, %v2789_v23  ;;  %v2791_v36 = vpop.eup %2790 }
 0x128   :  { %v573_v39 = vmul.f32 0.5, %v2791_v36 }
 0x129   :  { %v569_v30 = vadd.f32 0.5, %v568_v26 }
 0x12a   :  { %v574_v42 = vadd.f32 0.5, %v573_v39 }
 0x12b   :  { %v576_v34 = vmul.f32 %v575_v27, %v569_v30 }
 0x12c   :  { %v579_v47 = vsub.f32 1.0, %v574_v42  ;;  %v581_v52 = vmul.f32 0.0, %v574_v42 }
 0x12d   :  { %v577_v37 = vadd.f32 %v576_v34, %v348_v31 }
 0x12f   :  { %2792 = vtanh.f32 %v577_v37 }
 0x139   :  { %v2793_v50 = vpop.eup %2792 }
 0x13a   :  { %v580_v55 = vmul.f32 %v2793_v50, %v579_v47 }
 0x13c   :  { %v582_v57 = vadd.f32 %v581_v52, %v580_v55 }
 0x13e   :  { %654 = vmatmul.mubr.f32.vlgmr.msra.gmra.mrb[2].mxu0 %v582_v57  ;;  %2029 = vmatmul.mubr.f32.vlgmr.msra.gmra.mrb[10].mxu1 %v582_v57 }
 0x13f   :  { %2420 = vmatpush1.bf16.msra.mxu0 %v3040_v17  ;;  %2451 = vmatpush3.bf16.msra.mxu1 %v3086_v33 }
 0x140   :  { %2422 = vmatprep.subr.bf16.mxu0 %v3043_v18  ;;  %2452 = vmatprep.subr.bf16.mxu1 %v2837_v41 }
 0x141   :  { %818 = vmatprep.mubr.f32.mxu0 %v2836_v3  ;;  %2063 = vmatprep.mubr.msk.f32.mxu1 %vm2838_vm0, %v2836_v3 }
 0x143   :  { %2424 = vmatpush1.bf16.msra.mxu0 %v3063_v25  ;;  %2454 = vmatpush3.bf16.msra.mxu1 %v3118_v44 }
 0x144   :  { %2426 = vmatprep.subr.bf16.mxu0 %v3072_v28  ;;  %2455 = vmatprep.subr.bf16.mxu1 %v2837_v41 }
 0x147   :  { %2428 = vmatpush1.bf16.msra.mxu0 %v3093_v35  ;;  %2457 = vmatpush3.bf16.msra.mxu1 %v3150_v54 }
 0x148   :  { %2430 = vmatprep.subr.bf16.mxu0 %v3102_v38  ;;  %2458 = vmatprep.subr.bf16.mxu1 %v2837_v41 }
 0x14b   :  { %2432 = vmatpush1.bf16.msra.mxu0 %v3125_v46  ;;  %2460 = vmatpush3.bf16.msra.mxu1 %v3182_v0 }
 0x14c   :  { %2434 = vmatprep.subr.bf16.mxu0 %v3134_v49  ;;  %2461 = vmatprep.subr.bf16.mxu1 %v2837_v41 }
 0x14f   :  { %2436 = vmatpush1.bf16.msra.mxu0 %v3157_v56  ;;  %2463 = vmatpush3.bf16.msra.mxu1 %v3214_v12 }
 0x150   :  { %2438 = vmatprep.subr.bf16.mxu0 %v3166_v59  ;;  %2464 = vmatprep.subr.bf16.mxu1 %v2837_v41 }
 0x153   :  { %2440 = vmatpush1.bf16.msra.mxu0 %v3189_v2  ;;  %2466 = vmatpush3.bf16.msra.mxu1 %v3240_v22 }
 0x154   :  { %2442 = vmatprep.subr.bf16.mxu0 %v3198_v6  ;;  %2467 = vmatprep.subr.bf16.mxu1 %v2837_v41 }
 0x157   :  { %2444 = vmatpush1.bf16.msra.mxu0 %v3221_v14  ;;  %2469 = vmatpush3.bf16.msra.mxu1 %v3258_v29 }
 0x158   :  { %2446 = vmatprep.subr.bf16.mxu0 %v3230_v19  ;;  %2470 = vmatprep.subr.bf16.mxu1 %v2837_v41 }
 0x15b   :  { %2448 = vmatpush1.bf16.msra.mxu0 %v3247_v24  ;;  %2472 = vmatpush3.bf16.msra.mxu1 %v3274_v32 }
 0x15c   :  { %2474 = vmatprep.subr.bf16.mxu0 %v3020_v10  ;;  %2505 = vmatprep.subr.bf16.mxu1 %v2837_v41 }
 0x211   :  { %v655_v40 = vpop.f32.mrb[2].mxu0  ;;  %v726_v45 = vpop.f32.mrb[10].mxu1 }
 0x212   :  { %v2755_v60 = vadd.f32 %v655_v40, %v3328_v61  ;;  %v657_v62 = vpop.f32.mrb[3].mxu0  ;;  %v2030_v1 = vpop.f32.mrb[11].mxu1  ;;  %v740_v16 = vadd.f32 %v3341_v21, %v726_v45 }
 0x213   :  { %v2756_v8 = vadd.f32 %v657_v62, %v3332_v5 }
 0x214   :  { %v731_v4 = vmul.f32 0.5, %v2755_v60 }
 0x215   :  { %v736_v9 = vmul.f32 0.5, %v2756_v8 }
 0x216   :  { %2794 = vtanh.f32 %v731_v4 }
 0x217   :  { %2796 = vtanh.f32 %v736_v9 }
 0x220   :  { %v2795_v11 = vpop.eup %2794 }
 0x221   :  { %v733_v13 = vmul.f32 0.5, %v2795_v11  ;;  %v2797_v23 = vpop.eup %2796 }
 0x222   :  { %v738_v27 = vmul.f32 0.5, %v2797_v23 }
 0x223   :  { %v734_v15 = vadd.f32 0.5, %v733_v13 }
 0x224   :  { %v739_v30 = vadd.f32 0.5, %v738_v27 }
 0x225   :  { %v741_v20 = vmul.f32 %v740_v16, %v734_v15 }
 0x226   :  { %v744_v31 = vsub.f32 1.0, %v739_v30  ;;  %v746_v37 = vmul.f32 %v739_v30, %v582_v57 }
 0x227   :  { %v742_v26 = vadd.f32 %v741_v20, %v3318_v43 }
 0x229   :  { %2798 = vtanh.f32 %v742_v26 }
 0x233   :  { %v2799_v34 = vpop.eup %2798 }
 0x234   :  { %v745_v36 = vmul.f32 %v2799_v34, %v744_v31 }
 0x236   :  { %v747_v39 = vadd.f32 %v746_v37, %v745_v36 }
 0x238   :  { %819 = vmatmul.mubr.f32.vlgmr.msra.gmra.mrb[4].mxu0 %v747_v39  ;;  %2064 = vmatmul.mubr.f32.vlgmr.msra.gmra.mrb[12].mxu1 %v747_v39 }
 0x239   :  { %2476 = vmatpush1.bf16.msra.mxu0 %v3040_v17  ;;  %2507 = vmatpush3.bf16.msra.mxu1 %v3086_v33 }
 0x23a   :  { %2478 = vmatprep.subr.bf16.mxu0 %v3043_v18  ;;  %2508 = vmatprep.subr.bf16.mxu1 %v2837_v41 }
 0x23b   :  { %983 = vmatprep.mubr.f32.mxu0 %v2836_v3  ;;  %2098 = vmatprep.mubr.msk.f32.mxu1 %vm2838_vm0, %v2836_v3 }
 0x23d   :  { %2480 = vmatpush1.bf16.msra.mxu0 %v3063_v25  ;;  %2510 = vmatpush3.bf16.msra.mxu1 %v3118_v44 }
 0x23e   :  { %2482 = vmatprep.subr.bf16.mxu0 %v3072_v28  ;;  %2511 = vmatprep.subr.bf16.mxu1 %v2837_v41 }
 0x241   :  { %2484 = vmatpush1.bf16.msra.mxu0 %v3093_v35  ;;  %2513 = vmatpush3.bf16.msra.mxu1 %v3150_v54 }
 0x242   :  { %2486 = vmatprep.subr.bf16.mxu0 %v3102_v38  ;;  %2514 = vmatprep.subr.bf16.mxu1 %v2837_v41 }
 0x245   :  { %2488 = vmatpush1.bf16.msra.mxu0 %v3125_v46  ;;  %2516 = vmatpush3.bf16.msra.mxu1 %v3182_v0 }
 0x246   :  { %2490 = vmatprep.subr.bf16.mxu0 %v3134_v49  ;;  %2517 = vmatprep.subr.bf16.mxu1 %v2837_v41 }
 0x249   :  { %2492 = vmatpush1.bf16.msra.mxu0 %v3157_v56  ;;  %2519 = vmatpush3.bf16.msra.mxu1 %v3214_v12 }
 0x24a   :  { %2494 = vmatprep.subr.bf16.mxu0 %v3166_v59  ;;  %2520 = vmatprep.subr.bf16.mxu1 %v2837_v41 }
 0x24d   :  { %2496 = vmatpush1.bf16.msra.mxu0 %v3189_v2  ;;  %2522 = vmatpush3.bf16.msra.mxu1 %v3240_v22 }
 0x24e   :  { %2498 = vmatprep.subr.bf16.mxu0 %v3198_v6  ;;  %2523 = vmatprep.subr.bf16.mxu1 %v2837_v41 }
 0x251   :  { %2500 = vmatpush1.bf16.msra.mxu0 %v3221_v14  ;;  %2525 = vmatpush3.bf16.msra.mxu1 %v3258_v29 }
 0x252   :  { %2502 = vmatprep.subr.bf16.mxu0 %v3230_v19  ;;  %2526 = vmatprep.subr.bf16.mxu1 %v2837_v41 }
 0x255   :  { %2504 = vmatpush1.bf16.msra.mxu0 %v3247_v24  ;;  %2528 = vmatpush3.bf16.msra.mxu1 %v3274_v32 }
 0x256   :  { %2530 = vmatprep.subr.bf16.mxu0 %v3020_v10  ;;  %2561 = vmatprep.subr.bf16.mxu1 %v2837_v41 }
 0x30b   :  { %v820_v43 = vpop.f32.mrb[4].mxu0  ;;  %v891_v42 = vpop.f32.mrb[12].mxu1 }
 0x30c   :  { %v2757_v47 = vadd.f32 %v820_v43, %v3328_v61  ;;  %v822_v50 = vpop.f32.mrb[5].mxu0  ;;  %v2065_v52 = vpop.f32.mrb[13].mxu1  ;;  %v905_v1 = vadd.f32 %v3341_v21, %v891_v42 }
 0x30d   :  { %v2758_v57 = vadd.f32 %v822_v50, %v3332_v5 }
 0x30e   :  { %v896_v55 = vmul.f32 0.5, %v2757_v47 }
 0x30f   :  { %v901_v40 = vmul.f32 0.5, %v2758_v57 }
 0x310   :  { %2800 = vtanh.f32 %v896_v55 }
 0x311   :  { %2802 = vtanh.f32 %v901_v40 }
 0x31a   :  { %v2801_v45 = vpop.eup %2800 }
 0x31b   :  { %v898_v60 = vmul.f32 0.5, %v2801_v45  ;;  %v2803_v8 = vpop.eup %2802 }
 0x31c   :  { %v903_v11 = vmul.f32 0.5, %v2803_v8 }
 0x31d   :  { %v899_v62 = vadd.f32 0.5, %v898_v60 }
 0x31e   :  { %v904_v13 = vadd.f32 0.5, %v903_v11 }
 0x31f   :  { %v906_v4 = vmul.f32 %v905_v1, %v899_v62 }
 0x320   :  { %v909_v15 = vsub.f32 1.0, %v904_v13  ;;  %v911_v23 = vmul.f32 %v904_v13, %v747_v39 }
 0x321   :  { %v907_v9 = vadd.f32 %v906_v4, %v3322_v51 }
 0x323   :  { %2804 = vtanh.f32 %v907_v9 }
 0x32d   :  { %v2805_v16 = vpop.eup %2804 }
 0x32e   :  { %v910_v20 = vmul.f32 %v2805_v16, %v909_v15 }
 0x330   :  { %v912_v26 = vadd.f32 %v911_v23, %v910_v20 }
 0x332   :  { %984 = vmatmul.mubr.f32.vlgmr.msra.gmra.mrb[6].mxu0 %v912_v26  ;;  %2099 = vmatmul.mubr.f32.vlgmr.msra.gmra.mrb[14].mxu1 %v912_v26 }
 0x333   :  { %2532 = vmatpush1.bf16.msra.mxu0 %v3040_v17  ;;  %2563 = vmatpush3.bf16.msra.mxu1 %v3086_v33 }
 0x334   :  { %2534 = vmatprep.subr.bf16.mxu0 %v3043_v18  ;;  %2564 = vmatprep.subr.bf16.mxu1 %v2837_v41 }
 0x335   :  { %1148 = vmatprep.mubr.f32.mxu0 %v2836_v3  ;;  %2133 = vmatprep.mubr.msk.f32.mxu1 %vm2838_vm0, %v2836_v3 }
 0x337   :  { %2536 = vmatpush1.bf16.msra.mxu0 %v3063_v25  ;;  %2566 = vmatpush3.bf16.msra.mxu1 %v3118_v44 }
 0x338   :  { %2538 = vmatprep.subr.bf16.mxu0 %v3072_v28  ;;  %2567 = vmatprep.subr.bf16.mxu1 %v2837_v41 }
 0x33b   :  { %2540 = vmatpush1.bf16.msra.mxu0 %v3093_v35  ;;  %2569 = vmatpush3.bf16.msra.mxu1 %v3150_v54 }
 0x33c   :  { %2542 = vmatprep.subr.bf16.mxu0 %v3102_v38  ;;  %2570 = vmatprep.subr.bf16.mxu1 %v2837_v41 }
 0x33f   :  { %2544 = vmatpush1.bf16.msra.mxu0 %v3125_v46  ;;  %2572 = vmatpush3.bf16.msra.mxu1 %v3182_v0 }
 0x340   :  { %2546 = vmatprep.subr.bf16.mxu0 %v3134_v49  ;;  %2573 = vmatprep.subr.bf16.mxu1 %v2837_v41 }
 0x343   :  { %2548 = vmatpush1.bf16.msra.mxu0 %v3157_v56  ;;  %2575 = vmatpush3.bf16.msra.mxu1 %v3214_v12 }
 0x344   :  { %2550 = vmatprep.subr.bf16.mxu0 %v3166_v59  ;;  %2576 = vmatprep.subr.bf16.mxu1 %v2837_v41 }
 0x347   :  { %2552 = vmatpush1.bf16.msra.mxu0 %v3189_v2  ;;  %2578 = vmatpush3.bf16.msra.mxu1 %v3240_v22 }
 0x348   :  { %2554 = vmatprep.subr.bf16.mxu0 %v3198_v6  ;;  %2579 = vmatprep.subr.bf16.mxu1 %v2837_v41 }
 0x34b   :  { %2556 = vmatpush1.bf16.msra.mxu0 %v3221_v14  ;;  %2581 = vmatpush3.bf16.msra.mxu1 %v3258_v29 }
 0x34c   :  { %2558 = vmatprep.subr.bf16.mxu0 %v3230_v19  ;;  %2582 = vmatprep.subr.bf16.mxu1 %v2837_v41 }
 0x34f   :  { %2560 = vmatpush1.bf16.msra.mxu0 %v3247_v24  ;;  %2584 = vmatpush3.bf16.msra.mxu1 %v3274_v32 }
 0x350   :  { %2586 = vmatprep.subr.bf16.mxu0 %v3020_v10  ;;  %2617 = vmatprep.subr.bf16.mxu1 %v2837_v41 }
 0x405   :  { %v985_v51 = vpop.f32.mrb[6].mxu0  ;;  %v1056_v27 = vpop.f32.mrb[14].mxu1 }
 0x406   :  { %v2759_v30 = vadd.f32 %v985_v51, %v3328_v61  ;;  %v987_v31 = vpop.f32.mrb[7].mxu0  ;;  %v2100_v34 = vpop.f32.mrb[15].mxu1  ;;  %v1070_v50 = vadd.f32 %v3341_v21, %v1056_v27 }
 0x407   :  { %v2760_v37 = vadd.f32 %v987_v31, %v3332_v5 }
 0x408   :  { %v1061_v36 = vmul.f32 0.5, %v2759_v30 }
 0x409   :  { %v1066_v39 = vmul.f32 0.5, %v2760_v37 }
 0x40a   :  { %2806 = vtanh.f32 %v1061_v36 }
 0x40b   :  { %2808 = vtanh.f32 %v1066_v39 }
 0x414   :  { %v2807_v43 = vpop.eup %2806 }
 0x415   :  { %v1063_v42 = vmul.f32 0.5, %v2807_v43  ;;  %v2809_v55 = vpop.eup %2808 }
 0x416   :  { %v1068_v40 = vmul.f32 0.5, %v2809_v55 }
 0x417   :  { %v1064_v47 = vadd.f32 0.5, %v1063_v42 }
 0x418   :  { %v1069_v45 = vadd.f32 0.5, %v1068_v40 }
 0x419   :  { %v1071_v52 = vmul.f32 %v1070_v50, %v1064_v47 }
 0x41a   :  { %v1074_v60 = vsub.f32 1.0, %v1069_v45  ;;  %v1076_v4 = vmul.f32 %v1069_v45, %v912_v26 }
 0x41b   :  { %v1072_v57 = vadd.f32 %v1071_v52, %v3320_v48 }
 0x41d   :  { %2810 = vtanh.f32 %v1072_v57 }
 0x427   :  { %v2811_v62 = vpop.eup %2810 }
 0x428   :  { %v1075_v1 = vmul.f32 %v2811_v62, %v1074_v60 }
 0x42a   :  { %v1077_v8 = vadd.f32 %v1076_v4, %v1075_v1 }
 0x42c   :  { %1149 = vmatmul.mubr.f32.vlgmr.msra.gmra.mrb[8].mxu0 %v1077_v8  ;;  %2134 = vmatmul.mubr.f32.vlgmr.msra.gmra.mrb[16].mxu1 %v1077_v8 }
 0x42d   :  { %2588 = vmatpush1.bf16.msra.mxu0 %v3040_v17  ;;  %2619 = vmatpush3.bf16.msra.mxu1 %v3086_v33 }
 0x42e   :  { %2590 = vmatprep.subr.bf16.mxu0 %v3043_v18  ;;  %2620 = vmatprep.subr.bf16.mxu1 %v2837_v41 }
 0x42f   :  { %1313 = vmatprep.mubr.f32.mxu0 %v2836_v3  ;;  %2168 = vmatprep.mubr.msk.f32.mxu1 %vm2838_vm0, %v2836_v3 }
 0x431   :  { %2592 = vmatpush1.bf16.msra.mxu0 %v3063_v25  ;;  %2622 = vmatpush3.bf16.msra.mxu1 %v3118_v44 }
 0x432   :  { %2594 = vmatprep.subr.bf16.mxu0 %v3072_v28  ;;  %2623 = vmatprep.subr.bf16.mxu1 %v2837_v41 }
 0x435   :  { %2596 = vmatpush1.bf16.msra.mxu0 %v3093_v35  ;;  %2625 = vmatpush3.bf16.msra.mxu1 %v3150_v54 }
 0x436   :  { %2598 = vmatprep.subr.bf16.mxu0 %v3102_v38  ;;  %2626 = vmatprep.subr.bf16.mxu1 %v2837_v41 }
 0x439   :  { %2600 = vmatpush1.bf16.msra.mxu0 %v3125_v46  ;;  %2628 = vmatpush3.bf16.msra.mxu1 %v3182_v0 }
 0x43a   :  { %2602 = vmatprep.subr.bf16.mxu0 %v3134_v49  ;;  %2629 = vmatprep.subr.bf16.mxu1 %v2837_v41 }
 0x43d   :  { %2604 = vmatpush1.bf16.msra.mxu0 %v3157_v56  ;;  %2631 = vmatpush3.bf16.msra.mxu1 %v3214_v12 }
 0x43e   :  { %2606 = vmatprep.subr.bf16.mxu0 %v3166_v59  ;;  %2632 = vmatprep.subr.bf16.mxu1 %v2837_v41 }
 0x441   :  { %2608 = vmatpush1.bf16.msra.mxu0 %v3189_v2  ;;  %2634 = vmatpush3.bf16.msra.mxu1 %v3240_v22 }
 0x442   :  { %2610 = vmatprep.subr.bf16.mxu0 %v3198_v6  ;;  %2635 = vmatprep.subr.bf16.mxu1 %v2837_v41 }
 0x445   :  { %2612 = vmatpush1.bf16.msra.mxu0 %v3221_v14  ;;  %2637 = vmatpush3.bf16.msra.mxu1 %v3258_v29 }
 0x446   :  { %2614 = vmatprep.subr.bf16.mxu0 %v3230_v19  ;;  %2638 = vmatprep.subr.bf16.mxu1 %v2837_v41 }
 0x449   :  { %2616 = vmatpush1.bf16.msra.mxu0 %v3247_v24  ;;  %2640 = vmatpush3.bf16.msra.mxu1 %v3274_v32 }
 0x44a   :  { %2642 = vmatprep.subr.bf16.mxu0 %v3020_v10  ;;  %2673 = vmatprep.subr.bf16.mxu1 %v2837_v41 }
 0x4ff   :  { %v1150_v48 = vpop.f32.mrb[8].mxu0  ;;  %v1221_v9 = vpop.f32.mrb[16].mxu1 }
 0x500   :  { %v2761_v11 = vadd.f32 %v1150_v48, %v3328_v61  ;;  %v1152_v13 = vpop.f32.mrb[9].mxu0  ;;  %v2135_v15 = vpop.f32.mrb[17].mxu1  ;;  %v1235_v30 = vadd.f32 %v3341_v21, %v1221_v9 }
 0x501   :  { %v2762_v20 = vadd.f32 %v1152_v13, %v3332_v5 }
 0x502   :  { %v1226_v16 = vmul.f32 0.5, %v2761_v11 }
 0x503   :  { %v1231_v23 = vmul.f32 0.5, %v2762_v20 }
 0x504   :  { %2812 = vtanh.f32 %v1226_v16 }
 0x505   :  { %2814 = vtanh.f32 %v1231_v23 }
 0x50e   :  { %v2813_v26 = vpop.eup %2812 }
 0x50f   :  { %v1228_v51 = vmul.f32 0.5, %v2813_v26  ;;  %v2815_v34 = vpop.eup %2814 }
 0x510   :  { %v1233_v37 = vmul.f32 0.5, %v2815_v34 }
 0x511   :  { %v1229_v27 = vadd.f32 0.5, %v1228_v51 }
 0x512   :  { %v1234_v39 = vadd.f32 0.5, %v1233_v37 }
 0x513   :  { %v1236_v31 = vmul.f32 %v1235_v30, %v1229_v27 }
 0x514   :  { %v1239_v43 = vsub.f32 1.0, %v1234_v39  ;;  %v1241_v50 = vmul.f32 %v1234_v39, %v1077_v8 }
 0x515   :  { %v1237_v36 = vadd.f32 %v1236_v31, %v3326_v58 }
 0x517   :  { %2816 = vtanh.f32 %v1237_v36 }
 0x521   :  { %v2817_v42 = vpop.eup %2816 }
 0x522   :  { %v1240_v47 = vmul.f32 %v2817_v42, %v1239_v43 }
 0x524   :  { %v1242_v52 = vadd.f32 %v1241_v50, %v1240_v47 }
 0x526   :  { %1314 = vmatmul.mubr.f32.vlgmr.msra.gmra.mrb[10].mxu0 %v1242_v52  ;;  %2169 = vmatmul.mubr.f32.vlgmr.msra.gmra.mrb[18].mxu1 %v1242_v52 }
 0x527   :  { %2644 = vmatpush1.bf16.msra.mxu0 %v3040_v17  ;;  %2675 = vmatpush3.bf16.msra.mxu1 %v3086_v33 }
 0x528   :  { %2646 = vmatprep.subr.bf16.mxu0 %v3043_v18  ;;  %2676 = vmatprep.subr.bf16.mxu1 %v2837_v41 }
 0x529   :  { %1478 = vmatprep.mubr.f32.mxu0 %v2836_v3  ;;  %2203 = vmatprep.mubr.msk.f32.mxu1 %vm2838_vm0, %v2836_v3 }
 0x52b   :  { %2648 = vmatpush1.bf16.msra.mxu0 %v3063_v25  ;;  %2678 = vmatpush3.bf16.msra.mxu1 %v3118_v44 }
 0x52c   :  { %2650 = vmatprep.subr.bf16.mxu0 %v3072_v28  ;;  %2679 = vmatprep.subr.bf16.mxu1 %v2837_v41 }
 0x52f   :  { %2652 = vmatpush1.bf16.msra.mxu0 %v3093_v35  ;;  %2681 = vmatpush3.bf16.msra.mxu1 %v3150_v54 }
 0x530   :  { %2654 = vmatprep.subr.bf16.mxu0 %v3102_v38  ;;  %2682 = vmatprep.subr.bf16.mxu1 %v2837_v41 }
 0x533   :  { %2656 = vmatpush1.bf16.msra.mxu0 %v3125_v46  ;;  %2684 = vmatpush3.bf16.msra.mxu1 %v3182_v0 }
 0x534   :  { %2658 = vmatprep.subr.bf16.mxu0 %v3134_v49  ;;  %2685 = vmatprep.subr.bf16.mxu1 %v2837_v41 }
 0x537   :  { %2660 = vmatpush1.bf16.msra.mxu0 %v3157_v56  ;;  %2687 = vmatpush3.bf16.msra.mxu1 %v3214_v12 }
 0x538   :  { %2662 = vmatprep.subr.bf16.mxu0 %v3166_v59  ;;  %2688 = vmatprep.subr.bf16.mxu1 %v2837_v41 }
 0x53b   :  { %2664 = vmatpush1.bf16.msra.mxu0 %v3189_v2  ;;  %2690 = vmatpush3.bf16.msra.mxu1 %v3240_v22 }
 0x53c   :  { %2666 = vmatprep.subr.bf16.mxu0 %v3198_v6  ;;  %2691 = vmatprep.subr.bf16.mxu1 %v2837_v41 }
 0x53f   :  { %2668 = vmatpush1.bf16.msra.mxu0 %v3221_v14  ;;  %2693 = vmatpush3.bf16.msra.mxu1 %v3258_v29 }
 0x540   :  { %2670 = vmatprep.subr.bf16.mxu0 %v3230_v19  ;;  %2694 = vmatprep.subr.bf16.mxu1 %v2837_v41 }
 0x543   :  { %2672 = vmatpush1.bf16.msra.mxu0 %v3247_v24  ;;  %2696 = vmatpush3.bf16.msra.mxu1 %v3274_v32 }
 0x544   :  { %2698 = vmatprep.subr.bf16.mxu0 %v3020_v10  ;;  %2729 = vmatprep.subr.bf16.mxu1 %v2837_v41 }
 0x5f9   :  { %v1315_v58 = vpop.f32.mrb[10].mxu0  ;;  %v1386_v55 = vpop.f32.mrb[18].mxu1 }
 0x5fa   :  { %v2763_v57 = vadd.f32 %v1315_v58, %v3328_v61  ;;  %v1317_v40 = vpop.f32.mrb[11].mxu0  ;;  %v2170_v45 = vpop.f32.mrb[19].mxu1  ;;  %v1400_v9 = vadd.f32 %v3341_v21, %v1386_v55 }
 0x5fb   :  { %v2764_v62 = vadd.f32 %v1317_v40, %v3332_v5 }
 0x5fc   :  { %v1391_v60 = vmul.f32 0.5, %v2763_v57 }
 0x5fd   :  { %v1396_v1 = vmul.f32 0.5, %v2764_v62 }
 0x5fe   :  { %2818 = vtanh.f32 %v1391_v60 }
 0x5ff   :  { %2820 = vtanh.f32 %v1396_v1 }
 0x608   :  { %v2819_v4 = vpop.eup %2818 }
 0x609   :  { %v1393_v8 = vmul.f32 0.5, %v2819_v4  ;;  %v2821_v11 = vpop.eup %2820 }
 0x60a   :  { %v1398_v15 = vmul.f32 0.5, %v2821_v11 }
 0x60b   :  { %v1394_v48 = vadd.f32 0.5, %v1393_v8 }
 0x60c   :  { %v1399_v16 = vadd.f32 0.5, %v1398_v15 }
 0x60d   :  { %v1401_v10 = vmul.f32 %v1400_v9, %v1394_v48 }
 0x60e   :  { %v1404_v20 = vsub.f32 1.0, %v1399_v16  ;;  %v1406_v51 = vmul.f32 %v1399_v16, %v1242_v52 }
 0x60f   :  { %v1402_v13 = vadd.f32 %v1401_v10, %v3324_v53 }
 0x611   :  { %2822 = vtanh.f32 %v1402_v13 }
 0x61b   :  { %v2823_v23 = vpop.eup %2822 }
 0x61c   :  { %v1405_v26 = vmul.f32 %v2823_v23, %v1404_v20 }
 0x61e   :  { %v1407_v27 = vadd.f32 %v1406_v51, %v1405_v26 }
 0x620   :  { %1479 = vmatmul.mubr.f32.vlgmr.msra.gmra.mrb[12].mxu0 %v1407_v27  ;;  %2204 = vmatmul.mubr.f32.vlgmr.msra.gmra.mrb[20].mxu1 %v1407_v27 }
 0x621   :  { %2700 = vmatpush1.bf16.msra.mxu0 %v3040_v17  ;;  %2731 = vmatpush3.bf16.msra.mxu1 %v3086_v33 }
 0x622   :  { %2702 = vmatprep.subr.bf16.mxu0 %v3043_v18  ;;  %2732 = vmatprep.subr.bf16.mxu1 %v2837_v41 }
 0x623   :  { %1643 = vmatprep.mubr.f32.mxu0 %v2836_v3  ;;  %2238 = vmatprep.mubr.msk.f32.mxu1 %vm2838_vm0, %v2836_v3 }
 0x625   :  { %2704 = vmatpush1.bf16.msra.mxu0 %v3063_v25  ;;  %2734 = vmatpush3.bf16.msra.mxu1 %v3118_v44 }
 0x626   :  { %2706 = vmatprep.subr.bf16.mxu0 %v3072_v28  ;;  %2735 = vmatprep.subr.bf16.mxu1 %v2837_v41 }
 0x629   :  { %2708 = vmatpush1.bf16.msra.mxu0 %v3093_v35  ;;  %2737 = vmatpush3.bf16.msra.mxu1 %v3150_v54 }
 0x62a   :  { %2710 = vmatprep.subr.bf16.mxu0 %v3102_v38  ;;  %2738 = vmatprep.subr.bf16.mxu1 %v2837_v41 }
 0x62d   :  { %2712 = vmatpush1.bf16.msra.mxu0 %v3125_v46  ;;  %2740 = vmatpush3.bf16.msra.mxu1 %v3182_v0 }
 0x62e   :  { %2714 = vmatprep.subr.bf16.mxu0 %v3134_v49  ;;  %2741 = vmatprep.subr.bf16.mxu1 %v2837_v41 }
 0x631   :  { %2716 = vmatpush1.bf16.msra.mxu0 %v3157_v56  ;;  %2743 = vmatpush3.bf16.msra.mxu1 %v3214_v12 }
 0x632   :  { %2718 = vmatprep.subr.bf16.mxu0 %v3166_v59  ;;  %2744 = vmatprep.subr.bf16.mxu1 %v2837_v41 }
 0x635   :  { %2720 = vmatpush1.bf16.msra.mxu0 %v3189_v2  ;;  %2746 = vmatpush3.bf16.msra.mxu1 %v3240_v22 }
 0x636   :  { %2722 = vmatprep.subr.bf16.mxu0 %v3198_v6  ;;  %2747 = vmatprep.subr.bf16.mxu1 %v2837_v41 }
 0x639   :  { %2724 = vmatpush1.bf16.msra.mxu0 %v3221_v14  ;;  %2749 = vmatpush3.bf16.msra.mxu1 %v3258_v29 }
 0x63a   :  { %2726 = vmatprep.subr.bf16.mxu0 %v3230_v19  ;;  %2750 = vmatprep.subr.bf16.mxu1 %v2837_v41 }
 0x63d   :  { %2728 = vmatpush1.bf16.msra.mxu0 %v3247_v24  ;;  %2752 = vmatpush3.bf16.msra.mxu1 %v3274_v32 }
 0x6f3   :  { %v1480_v3 = vpop.f32.mrb[12].mxu0  ;;  %v1551_v17 = vpop.f32.mrb[20].mxu1 }
 0x6f4   :  { %v2765_v18 = vadd.f32 %v1480_v3, %v3328_v61  ;;  %v1482_v25 = vpop.f32.mrb[13].mxu0  ;;  %v2205_v28 = vpop.f32.mrb[21].mxu1  ;;  %v1565_v41 = vadd.f32 %v3341_v21, %v1551_v17 }
 0x6f5   :  { %v2766_v35 = vadd.f32 %v1482_v25, %v3332_v5 }
 0x6f6   :  { %v1556_v33 = vmul.f32 0.5, %v2765_v18 }
 0x6f7   :  { %v1561_v38 = vmul.f32 0.5, %v2766_v35 }
 0x6f8   :  { %2824 = vtanh.f32 %v1556_v33 }
 0x6f9   :  { %2826 = vtanh.f32 %v1561_v38 }
 0x702   :  { %v2825_v44 = vpop.eup %2824 }
 0x703   :  { %v1558_v46 = vmul.f32 0.5, %v2825_v44  ;;  %v2827_v56 = vpop.eup %2826 }
 0x704   :  { %v1563_v0 = vmul.f32 0.5, %v2827_v56 }
 0x705   :  { %v1559_v49 = vadd.f32 0.5, %v1558_v46 }
 0x706   :  { %v1564_v2 = vadd.f32 0.5, %v1563_v0 }
 0x707   :  { %v1566_v54 = vmul.f32 %v1565_v41, %v1559_v49 }
 0x708   :  { %v1569_v6 = vsub.f32 1.0, %v1564_v2  ;;  %v1571_v19 = vmul.f32 %v1564_v2, %v1407_v27 }
 0x709   :  { %v1567_v59 = vadd.f32 %v1566_v54, %v3334_v7 }
 0x70b   :  { %2828 = vtanh.f32 %v1567_v59 }
 0x715   :  { %v2829_v12 = vpop.eup %2828 }
 0x716   :  { %v1570_v14 = vmul.f32 %v2829_v12, %v1569_v6 }
 0x718   :  { %v1572_v22 = vadd.f32 %v1571_v19, %v1570_v14 }
 0x71a   :  { %1644 = vmatmul.mubr.f32.vlgmr.msra.gmra.mrb[14].mxu0 %v1572_v22  ;;  %2239 = vmatmul.mubr.f32.vlgmr.msra.gmra.mrb[22].mxu1 %v1572_v22 }
 0x7ed   :  { %v1645_v24 = vpop.f32.mrb[14].mxu0  ;;  %v1716_v29 = vpop.f32.mrb[22].mxu1 }
 0x7ee   :  { %v2767_v32 = vadd.f32 %v1645_v24, %v3328_v61  ;;  %v1647_v53 = vpop.f32.mrb[15].mxu0  ;;  %v2240_v30 = vpop.f32.mrb[23].mxu1  ;;  %v1730_v43 = vadd.f32 %v3341_v21, %v1716_v29 }
 0x7ef   :  { %v2768_v34 = vadd.f32 %v1647_v53, %v3332_v5 }
 0x7f0   :  { %v1721_v31 = vmul.f32 0.5, %v2767_v32 }
 0x7f1   :  { %v1726_v7 = vmul.f32 0.5, %v2768_v34 }
 0x7f2   :  { %2830 = vtanh.f32 %v1721_v31 }
 0x7f3   :  { %2832 = vtanh.f32 %v1726_v7 }
 0x7fc   :  { %v2831_v36 = vpop.eup %2830 }
 0x7fd   :  { %v1723_v37 = vmul.f32 0.5, %v2831_v36  ;;  %v2833_v47 = vpop.eup %2832 }
 0x7fe   :  { %v1728_v52 = vmul.f32 0.5, %v2833_v47 }
 0x7ff   :  { %v1724_v39 = vadd.f32 0.5, %v1723_v37 }
 0x800   :  { %v1729_v61 = vadd.f32 0.5, %v1728_v52 }
 0x801   :  { %v1731_v42 = vmul.f32 %v1730_v43, %v1724_v39 }
 0x802   :  { %v1734_v58 = vsub.f32 1.0, %v1729_v61  ;;  %v1736_v40 = vmul.f32 %v1729_v61, %v1572_v22 }
 0x803   :  { %v1732_v50 = vadd.f32 %v1731_v42, %v3330_v63 }
 0x805   :  { %2834 = vtanh.f32 %v1732_v50 }
 0x80f   :  { %v2835_v55 = vpop.eup %2834 }
 0x810   :  { %v1735_v57 = vmul.f32 %v2835_v55, %v1734_v58 }
 0x812   :  { %v1737_v5 = vadd.f32 %v1736_v40, %v1735_v57 }
 0x814   :  { %1738 = vst [vmem:[%s3588_s5] sm:$0xff] %v1737_v5 }

</bundles_post_ra>
